<compile_context>
chip_gen: v7x
topology: tpu7x:2x2x1
jax: 0.10.0
libtpu: 0.0.40
codegen_flags: <defaults>
</compile_context>

<pallas_src>
import functools

import numpy as np
import jax
import jax.numpy as jnp
from jax.experimental import pallas as pl
from jax.experimental.pallas import tpu as pltpu


def _mha_kernel(q_ref, k_ref, v_ref, mask_ref, wq_ref, wk_ref, wv_ref, wo_ref,
                out_ref,
                q_sc, m_sc, l_sc, acc_sc,
                *, n_heads, mask_heads):
    kv_step = pl.program_id(2)
    n_kv = pl.num_programs(2)

    # ---- init (once per (batch, q-tile)): per-head Q projection + softmax state.
    @pl.when(kv_step == 0)
    def _init():
        qb = q_ref[0].astype(jnp.bfloat16)                        # (tq, d1)
        for h in range(n_heads):
            # 1/sqrt(d) already folded into W_Q host-side.
            q_sc[h] = jnp.dot(qb, wq_ref[h],
                              preferred_element_type=jnp.float32
                              ).astype(jnp.bfloat16)              # (tq, d)
        m_sc[...] = jnp.full(m_sc.shape, -1e30, dtype=jnp.float32)
        l_sc[...] = jnp.zeros(l_sc.shape, dtype=jnp.float32)
        acc_sc[...] = jnp.zeros(acc_sc.shape, dtype=jnp.float32)

    k_tile = k_ref[0]                                             # (tk, d2) bf16
    v_tile = v_ref[0]                                             # (tk, d2) bf16

    # ---- per-head online-softmax update (unrolled; H is small and static).
    for h in range(n_heads):
        mask_h = mask_ref[0, h if mask_heads > 1 else 0]          # (tq, tk) f32

        k_h = jnp.dot(k_tile, wk_ref[h],
                      preferred_element_type=jnp.float32).astype(jnp.bfloat16)  # (tk, d)
        v_h = jnp.dot(v_tile, wv_ref[h],
                      preferred_element_type=jnp.float32).astype(jnp.bfloat16)  # (tk, d)

        s = jax.lax.dot_general(                                  # q_h @ k_h.T
            q_sc[h], k_h, (((1,), (1,)), ((), ())),
            preferred_element_type=jnp.float32)                   # (tq, tk) f32
        s = s + mask_h

        m_prev = m_sc[h]                                          # (tq, 1)
        m_new = jnp.maximum(m_prev, jnp.max(s, axis=-1, keepdims=True))
        alpha = jnp.exp(m_prev - m_new)                           # (tq, 1)
        p = jnp.exp(s - m_new)                                    # unnormalized probs

        l_sc[h] = alpha * l_sc[h] + jnp.sum(p, axis=-1, keepdims=True)
        acc_sc[h] = alpha * acc_sc[h] + jnp.dot(
            p.astype(jnp.bfloat16), v_h, preferred_element_type=jnp.float32)
        m_sc[h] = m_new

    # ---- finalize: deferred normalization, per-head output projection, residual.
    @pl.when(kv_step == n_kv - 1)
    def _finalize():
        out = q_ref[0]                                            # residual in f32
        for h in range(n_heads):
            # NOTE: fully-masked rows give l~Sk (uniform probs), same as torch softmax.
            inv_l = pl.reciprocal(l_sc[h], approx=True)           # (tq, 1), EUP
            ctx_h = (acc_sc[h] * inv_l).astype(jnp.bfloat16)      # (tq, d)
            out = out + jnp.dot(ctx_h, wo_ref[h],
                                preferred_element_type=jnp.float32)
        out_ref[0] = out


def _vmem_limit_bytes():
    # Keep headroom below physical VMEM (v7x: 64 MiB, v5e/v6e: 128 MiB).
    try:
        cap = pltpu.get_tpu_info().vmem_capacity_bytes
    except Exception:
        cap = 64 * 1024 * 1024
    return int(min(cap - 8 * 1024 * 1024, 100 * 1024 * 1024))


@functools.partial(jax.jit,
                   static_argnames=("n_heads", "d_dim", "q_tile", "kv_tile"))
def multi_head_attention(Q, K, V, attn_mask, Wq, Wk, Wv, Wo, *,
                         n_heads, d_dim, q_tile=256, kv_tile=512):
    B, Sq, d1 = Q.shape
    _, Sk, d2 = K.shape
    Hd = n_heads * d_dim
    assert Wq.shape == (d1, Hd) and Wk.shape == (d2, Hd)
    assert Wv.shape == (d2, Hd) and Wo.shape == (Hd, d1)

    tq = min(q_tile, Sq)
    tk = min(kv_tile, Sk)
    assert Sq % tq == 0, "Sq must be divisible by the Q tile size"
    assert Sk % tk == 0, "Sk must be divisible by the KV tile size"
    n_q, n_kv = Sq // tq, Sk // tk

    # ---- host-side (plain XLA) prep.
    scale = jnp.float32(1.0 / np.sqrt(d_dim))
    wq = (Wq * scale).reshape(d1, n_heads, d_dim).transpose(1, 0, 2).astype(jnp.bfloat16)
    wk = Wk.reshape(d2, n_heads, d_dim).transpose(1, 0, 2).astype(jnp.bfloat16)
    wv = Wv.reshape(d2, n_heads, d_dim).transpose(1, 0, 2).astype(jnp.bfloat16)
    wo = Wo.reshape(n_heads, d_dim, d1).astype(jnp.bfloat16)

    k_in = K.astype(jnp.bfloat16)
    v_in = V.astype(jnp.bfloat16)

    # Mask: keep broadcast dims thin (no B*H replication in HBM).
    if attn_mask is None:
        mask = jnp.zeros((1, 1, Sq, Sk), jnp.float32)
    else:
        mask = jnp.asarray(attn_mask, jnp.float32)
        while mask.ndim < 4:
            mask = mask[None]
    mb, mh = mask.shape[0], mask.shape[1]
    assert mb in (1, B) and mh in (1, n_heads)
    mask = jnp.broadcast_to(mask, (mb, mh, Sq, Sk))

    if mb > 1:
        mask_map = lambda b, qi, k: (b, 0, qi, k)
    else:
        mask_map = lambda b, qi, k: (0, 0, qi, k)

    kernel = functools.partial(_mha_kernel, n_heads=n_heads, mask_heads=mh)

    flops = B * (2 * Sq * d1 * Hd                       # Q projection
                 + n_q * 2 * Sk * d2 * Hd * 2           # K and V projections (per Q tile)
                 + 4 * n_heads * Sq * Sk * d_dim        # QK^T + P@V
                 + 2 * Sq * Hd * d1)                    # output projection
    bytes_accessed = (4 * B * Sq * d1 * 2               # Q in + out (f32)
                      + 2 * B * Sk * d2 * 2 * n_q       # bf16 K,V (refetched per Q tile)
                      + 4 * mb * mh * Sq * Sk           # f32 additive mask (broadcast-thin)
                      + 2 * (d1 * Hd + 2 * d2 * Hd + Hd * d1))   # bf16 weights
    cost = pl.CostEstimate(flops=int(flops),
                           transcendentals=int(B * n_heads * Sq * Sk),
                           bytes_accessed=int(bytes_accessed))

    return pl.pallas_call(
        kernel,
        out_shape=jax.ShapeDtypeStruct((B, Sq, d1), jnp.float32),
        grid=(B, n_q, n_kv),
        in_specs=[
            pl.BlockSpec((1, tq, d1), lambda b, qi, k: (b, qi, 0)),             # Q (f32)
            pl.BlockSpec((1, tk, d2), lambda b, qi, k: (b, k, 0)),              # K (bf16)
            pl.BlockSpec((1, tk, d2), lambda b, qi, k: (b, k, 0)),              # V (bf16)
            pl.BlockSpec((1, mh, tq, tk), mask_map),                            # mask tile
            pl.BlockSpec((n_heads, d1, d_dim), lambda b, qi, k: (0, 0, 0)),     # W_Q*scale
            pl.BlockSpec((n_heads, d2, d_dim), lambda b, qi, k: (0, 0, 0)),     # W_K
            pl.BlockSpec((n_heads, d2, d_dim), lambda b, qi, k: (0, 0, 0)),     # W_V
            pl.BlockSpec((n_heads, d_dim, d1), lambda b, qi, k: (0, 0, 0)),     # W_O
        ],
        out_specs=pl.BlockSpec((1, tq, d1), lambda b, qi, k: (b, qi, 0)),
        scratch_shapes=[
            pltpu.VMEM((n_heads, tq, d_dim), jnp.bfloat16),   # projected Q (per head)
            pltpu.VMEM((n_heads, tq, 1), jnp.float32),        # running max  m
            pltpu.VMEM((n_heads, tq, 1), jnp.float32),        # running sum  l
            pltpu.VMEM((n_heads, tq, d_dim), jnp.float32),    # unnormalized context acc
        ],
        compiler_params=pltpu.CompilerParams(
            dimension_semantics=("parallel", "parallel", "arbitrary"),
            vmem_limit_bytes=_vmem_limit_bytes()),
        cost_estimate=cost,
    )(Q, k_in, v_in, mask, wq, wk, wv, wo)


def _reference(Q, K, V, attn_mask, Wq, Wk, Wv, Wo, *, n_heads, d_dim):
    B, Sq, d1 = Q.shape
    q_s = (Q @ Wq).reshape(B, Sq, n_heads, d_dim).transpose(0, 2, 1, 3)
    k_s = (K @ Wk).reshape(B, -1, n_heads, d_dim).transpose(0, 2, 1, 3)
    v_s = (V @ Wv).reshape(B, -1, n_heads, d_dim).transpose(0, 2, 1, 3)
    scores = jnp.einsum("bhqd,bhkd->bhqk", q_s, k_s) / np.sqrt(d_dim)
    if attn_mask is not None:
        scores = scores + attn_mask
    attn = jax.nn.softmax(scores, axis=-1)
    ctx = jnp.einsum("bhqk,bhkd->bhqd", attn, v_s)
    ctx = ctx.transpose(0, 2, 1, 3).reshape(B, Sq, n_heads * d_dim)
    return ctx @ Wo + Q


if __name__ == "__main__":
    d_model_1 = 32
    d_model_2 = 16
    n_heads = 4
    d_dim = 8
    B, Sq, Sk = 2, 8, 8

    key = jax.random.PRNGKey(0)
    kq, kk, kv, kwq, kwk, kwv, kwo = jax.random.split(key, 7)

    Q = jax.random.normal(kq, (B, Sq, d_model_1), dtype=jnp.float32)
    K = jax.random.normal(kk, (B, Sk, d_model_2), dtype=jnp.float32)
    V = jax.random.normal(kv, (B, Sk, d_model_2), dtype=jnp.float32)

    # Weights stored as (in, out) = transpose of torch Linear.weight.
    Wq = jax.random.normal(kwq, (d_model_1, n_heads * d_dim), dtype=jnp.float32) * 0.1
    Wk = jax.random.normal(kwk, (d_model_2, n_heads * d_dim), dtype=jnp.float32) * 0.1
    Wv = jax.random.normal(kwv, (d_model_2, n_heads * d_dim), dtype=jnp.float32) * 0.1
    Wo = jax.random.normal(kwo, (n_heads * d_dim, d_model_1), dtype=jnp.float32) * 0.1

    # Additive causal mask, broadcast over batch and heads (kept thin in HBM).
    causal = jnp.where(
        jnp.arange(Sq)[:, None] >= jnp.arange(Sk)[None, :], 0.0, -1e9
    ).astype(jnp.float32)
    attn_mask = causal[None, None]                       # (1, 1, Sq, Sk)

    out = multi_head_attention(Q, K, V, attn_mask, Wq, Wk, Wv, Wo,
                               n_heads=n_heads, d_dim=d_dim)
    out = jax.block_until_ready(out)

    ref = _reference(Q, K, V, attn_mask, Wq, Wk, Wv, Wo,
                     n_heads=n_heads, d_dim=d_dim)
    # bf16 MXU operands with f32 accumulation + approx reciprocal -> loose tol.
    np.testing.assert_allclose(np.asarray(out), np.asarray(ref),
                               rtol=2e-2, atol=2e-2)

    print("KERNEL_OK")
</pallas_src>

<mosaic_0001>
module attributes {stable_mosaic.version = 11 : i64} {
  func.func @_mha_kernel(%arg0: i32, %arg1: i32, %arg2: i32, %arg3: memref<1x8x32xf32, #tpu.memory_space<vmem>>, %arg4: memref<1x8x16xbf16, #tpu.memory_space<vmem>>, %arg5: memref<1x8x16xbf16, #tpu.memory_space<vmem>>, %arg6: memref<1x1x8x8xf32, #tpu.memory_space<vmem>>, %arg7: memref<4x32x8xbf16, #tpu.memory_space<vmem>>, %arg8: memref<4x16x8xbf16, #tpu.memory_space<vmem>>, %arg9: memref<4x16x8xbf16, #tpu.memory_space<vmem>>, %arg10: memref<4x8x32xbf16, #tpu.memory_space<vmem>>, %arg11: memref<1x8x32xf32, #tpu.memory_space<vmem>>, %arg12: memref<4x8x8xbf16, #tpu.memory_space<vmem>>, %arg13: memref<4x8x1xf32, #tpu.memory_space<vmem>>, %arg14: memref<4x8x1xf32, #tpu.memory_space<vmem>>, %arg15: memref<4x8x8xf32, #tpu.memory_space<vmem>>) attributes {dimension_semantics = [#tpu.dimension_semantics<parallel>, #tpu.dimension_semantics<parallel>, #tpu.dimension_semantics<arbitrary>], iteration_bounds = array<i64: 2, 1, 1>, scalar_prefetch = 0 : i64, scratch_operands = 4 : i64, tpu.core_type = #tpu.core_type<tc>, window_params = [{transform_indices = @transform_0, window_bounds = array<i64: 1, 8, 32>}, {transform_indices = @transform_1, window_bounds = array<i64: 1, 8, 16>}, {transform_indices = @transform_2, window_bounds = array<i64: 1, 8, 16>}, {transform_indices = @transform_3, window_bounds = array<i64: 1, 1, 8, 8>}, {pipeline_mode = #tpu.pipeline_mode<synchronous>, transform_indices = @transform_4, window_bounds = array<i64: 4, 32, 8>}, {pipeline_mode = #tpu.pipeline_mode<synchronous>, transform_indices = @transform_5, window_bounds = array<i64: 4, 16, 8>}, {pipeline_mode = #tpu.pipeline_mode<synchronous>, transform_indices = @transform_6, window_bounds = array<i64: 4, 16, 8>}, {pipeline_mode = #tpu.pipeline_mode<synchronous>, transform_indices = @transform_7, window_bounds = array<i64: 4, 8, 32>}, {transform_indices = @transform_8, window_bounds = array<i64: 1, 8, 32>}]} {
    %c0_i32 = arith.constant 0 : i32
    %0 = arith.cmpi eq, %arg2, %c0_i32 : i32
    %1 = arith.extui %0 : i1 to i32
    %c0_i32_0 = arith.constant 0 : i32
    %2 = arith.cmpi ne, %1, %c0_i32_0 : i32
    scf.if %2 {
      %c0_152 = arith.constant 0 : index
      %c0_153 = arith.constant 0 : index
      %c0_154 = arith.constant 0 : index
      %194 = vector.load %arg3[%c0_152, %c0_153, %c0_154] : memref<1x8x32xf32, #tpu.memory_space<vmem>>, vector<1x8x32xf32>
      %195 = vector.shape_cast %194 : vector<1x8x32xf32> to vector<8x32xf32>
      %196 = arith.truncf %195 : vector<8x32xf32> to vector<8x32xbf16>
      %c0_155 = arith.constant 0 : index
      %c0_156 = arith.constant 0 : index
      %c0_157 = arith.constant 0 : index
      %197 = vector.load %arg7[%c0_155, %c0_156, %c0_157] : memref<4x32x8xbf16, #tpu.memory_space<vmem>>, vector<1x32x8xbf16>
      %198 = vector.shape_cast %197 : vector<1x32x8xbf16> to vector<32x8xbf16>
      %cst_158 = arith.constant dense<0.000000e+00> : vector<8x8xf32>
      %199 = tpu.matmul %196, %198, %cst_158 {dimension_numbers = #tpu.dot_dimension_numbers<[1], [0], [0], [1], [0, 0, 1, 1], [], []>} : vector<8x32xbf16>, vector<32x8xbf16>, vector<8x8xf32> -> vector<8x8xf32>
      %200 = arith.truncf %199 : vector<8x8xf32> to vector<8x8xbf16>
      %c0_159 = arith.constant 0 : index
      %c0_160 = arith.constant 0 : index
      %c0_161 = arith.constant 0 : index
      %201 = vector.load %arg12[%c0_159, %c0_160, %c0_161] : memref<4x8x8xbf16, #tpu.memory_space<vmem>>, vector<1x8x8xbf16>
      %202 = vector.shape_cast %201 : vector<1x8x8xbf16> to vector<8x8xbf16>
      %203 = vector.shape_cast %200 : vector<8x8xbf16> to vector<1x8x8xbf16>
      tpu.vector_store %arg12[%c0_159, %c0_160, %c0_161], %203 {strides = array<i32>} : memref<4x8x8xbf16, #tpu.memory_space<vmem>>, vector<1x8x8xbf16>,
      %c1_162 = arith.constant 1 : index
      %c0_163 = arith.constant 0 : index
      %c0_164 = arith.constant 0 : index
      %204 = vector.load %arg7[%c1_162, %c0_163, %c0_164] : memref<4x32x8xbf16, #tpu.memory_space<vmem>>, vector<1x32x8xbf16>
      %205 = vector.shape_cast %204 : vector<1x32x8xbf16> to vector<32x8xbf16>
      %cst_165 = arith.constant dense<0.000000e+00> : vector<8x8xf32>
      %206 = tpu.matmul %196, %205, %cst_165 {dimension_numbers = #tpu.dot_dimension_numbers<[1], [0], [0], [1], [0, 0, 1, 1], [], []>} : vector<8x32xbf16>, vector<32x8xbf16>, vector<8x8xf32> -> vector<8x8xf32>
      %207 = arith.truncf %206 : vector<8x8xf32> to vector<8x8xbf16>
      %c1_166 = arith.constant 1 : index
      %c0_167 = arith.constant 0 : index
      %c0_168 = arith.constant 0 : index
      %208 = vector.load %arg12[%c1_166, %c0_167, %c0_168] : memref<4x8x8xbf16, #tpu.memory_space<vmem>>, vector<1x8x8xbf16>
      %209 = vector.shape_cast %208 : vector<1x8x8xbf16> to vector<8x8xbf16>
      %210 = vector.shape_cast %207 : vector<8x8xbf16> to vector<1x8x8xbf16>
      tpu.vector_store %arg12[%c1_166, %c0_167, %c0_168], %210 {strides = array<i32>} : memref<4x8x8xbf16, #tpu.memory_space<vmem>>, vector<1x8x8xbf16>,
      %c2_169 = arith.constant 2 : index
      %c0_170 = arith.constant 0 : index
      %c0_171 = arith.constant 0 : index
      %211 = vector.load %arg7[%c2_169, %c0_170, %c0_171] : memref<4x32x8xbf16, #tpu.memory_space<vmem>>, vector<1x32x8xbf16>
      %212 = vector.shape_cast %211 : vector<1x32x8xbf16> to vector<32x8xbf16>
      %cst_172 = arith.constant dense<0.000000e+00> : vector<8x8xf32>
      %213 = tpu.matmul %196, %212, %cst_172 {dimension_numbers = #tpu.dot_dimension_numbers<[1], [0], [0], [1], [0, 0, 1, 1], [], []>} : vector<8x32xbf16>, vector<32x8xbf16>, vector<8x8xf32> -> vector<8x8xf32>
      %214 = arith.truncf %213 : vector<8x8xf32> to vector<8x8xbf16>
      %c2_173 = arith.constant 2 : index
      %c0_174 = arith.constant 0 : index
      %c0_175 = arith.constant 0 : index
      %215 = vector.load %arg12[%c2_173, %c0_174, %c0_175] : memref<4x8x8xbf16, #tpu.memory_space<vmem>>, vector<1x8x8xbf16>
      %216 = vector.shape_cast %215 : vector<1x8x8xbf16> to vector<8x8xbf16>
      %217 = vector.shape_cast %214 : vector<8x8xbf16> to vector<1x8x8xbf16>
      tpu.vector_store %arg12[%c2_173, %c0_174, %c0_175], %217 {strides = array<i32>} : memref<4x8x8xbf16, #tpu.memory_space<vmem>>, vector<1x8x8xbf16>,
      %c3_176 = arith.constant 3 : index
      %c0_177 = arith.constant 0 : index
      %c0_178 = arith.constant 0 : index
      %218 = vector.load %arg7[%c3_176, %c0_177, %c0_178] : memref<4x32x8xbf16, #tpu.memory_space<vmem>>, vector<1x32x8xbf16>
      %219 = vector.shape_cast %218 : vector<1x32x8xbf16> to vector<32x8xbf16>
      %cst_179 = arith.constant dense<0.000000e+00> : vector<8x8xf32>
      %220 = tpu.matmul %196, %219, %cst_179 {dimension_numbers = #tpu.dot_dimension_numbers<[1], [0], [0], [1], [0, 0, 1, 1], [], []>} : vector<8x32xbf16>, vector<32x8xbf16>, vector<8x8xf32> -> vector<8x8xf32>
      %221 = arith.truncf %220 : vector<8x8xf32> to vector<8x8xbf16>
      %c3_180 = arith.constant 3 : index
      %c0_181 = arith.constant 0 : index
      %c0_182 = arith.constant 0 : index
      %222 = vector.load %arg12[%c3_180, %c0_181, %c0_182] : memref<4x8x8xbf16, #tpu.memory_space<vmem>>, vector<1x8x8xbf16>
      %223 = vector.shape_cast %222 : vector<1x8x8xbf16> to vector<8x8xbf16>
      %224 = vector.shape_cast %221 : vector<8x8xbf16> to vector<1x8x8xbf16>
      tpu.vector_store %arg12[%c3_180, %c0_181, %c0_182], %224 {strides = array<i32>} : memref<4x8x8xbf16, #tpu.memory_space<vmem>>, vector<1x8x8xbf16>,
      %cst_183 = arith.constant -1.000000e+30 : f32
      %225 = vector.broadcast %cst_183 : f32 to vector<4x8x1xf32>
      %c0_184 = arith.constant 0 : index
      %c0_185 = arith.constant 0 : index
      %c0_186 = arith.constant 0 : index
      %226 = vector.load %arg13[%c0_184, %c0_185, %c0_186] : memref<4x8x1xf32, #tpu.memory_space<vmem>>, vector<4x8x1xf32>
      tpu.vector_store %arg13[%c0_184, %c0_185, %c0_186], %225 {strides = array<i32>} : memref<4x8x1xf32, #tpu.memory_space<vmem>>, vector<4x8x1xf32>,
      %cst_187 = arith.constant 0.000000e+00 : f32
      %227 = vector.broadcast %cst_187 : f32 to vector<4x8x1xf32>
      %c0_188 = arith.constant 0 : index
      %c0_189 = arith.constant 0 : index
      %c0_190 = arith.constant 0 : index
      %228 = vector.load %arg14[%c0_188, %c0_189, %c0_190] : memref<4x8x1xf32, #tpu.memory_space<vmem>>, vector<4x8x1xf32>
      tpu.vector_store %arg14[%c0_188, %c0_189, %c0_190], %227 {strides = array<i32>} : memref<4x8x1xf32, #tpu.memory_space<vmem>>, vector<4x8x1xf32>,
      %cst_191 = arith.constant 0.000000e+00 : f32
      %229 = vector.broadcast %cst_191 : f32 to vector<4x8x8xf32>
      %c0_192 = arith.constant 0 : index
      %c0_193 = arith.constant 0 : index
      %c0_194 = arith.constant 0 : index
      %230 = vector.load %arg15[%c0_192, %c0_193, %c0_194] : memref<4x8x8xf32, #tpu.memory_space<vmem>>, vector<4x8x8xf32>
      tpu.vector_store %arg15[%c0_192, %c0_193, %c0_194], %229 {strides = array<i32>} : memref<4x8x8xf32, #tpu.memory_space<vmem>>, vector<4x8x8xf32>,
    } else {
    }
    %c0 = arith.constant 0 : index
    %c0_1 = arith.constant 0 : index
    %c0_2 = arith.constant 0 : index
    %3 = vector.load %arg4[%c0, %c0_1, %c0_2] : memref<1x8x16xbf16, #tpu.memory_space<vmem>>, vector<1x8x16xbf16>
    %4 = vector.shape_cast %3 : vector<1x8x16xbf16> to vector<8x16xbf16>
    %c0_3 = arith.constant 0 : index
    %c0_4 = arith.constant 0 : index
    %c0_5 = arith.constant 0 : index
    %5 = vector.load %arg5[%c0_3, %c0_4, %c0_5] : memref<1x8x16xbf16, #tpu.memory_space<vmem>>, vector<1x8x16xbf16>
    %6 = vector.shape_cast %5 : vector<1x8x16xbf16> to vector<8x16xbf16>
    %c0_6 = arith.constant 0 : index
    %c0_7 = arith.constant 0 : index
    %c0_8 = arith.constant 0 : index
    %c0_9 = arith.constant 0 : index
    %7 = vector.load %arg6[%c0_6, %c0_7, %c0_8, %c0_9] : memref<1x1x8x8xf32, #tpu.memory_space<vmem>>, vector<1x1x8x8xf32>
    %8 = vector.shape_cast %7 : vector<1x1x8x8xf32> to vector<8x8xf32>
    %c0_10 = arith.constant 0 : index
    %c0_11 = arith.constant 0 : index
    %c0_12 = arith.constant 0 : index
    %9 = vector.load %arg8[%c0_10, %c0_11, %c0_12] : memref<4x16x8xbf16, #tpu.memory_space<vmem>>, vector<1x16x8xbf16>
    %10 = vector.shape_cast %9 : vector<1x16x8xbf16> to vector<16x8xbf16>
    %cst = arith.constant dense<0.000000e+00> : vector<8x8xf32>
    %11 = tpu.matmul %4, %10, %cst {dimension_numbers = #tpu.dot_dimension_numbers<[1], [0], [0], [1], [0, 0, 1, 1], [], []>} : vector<8x16xbf16>, vector<16x8xbf16>, vector<8x8xf32> -> vector<8x8xf32>
    %12 = arith.truncf %11 : vector<8x8xf32> to vector<8x8xbf16>
    %c0_13 = arith.constant 0 : index
    %c0_14 = arith.constant 0 : index
    %c0_15 = arith.constant 0 : index
    %13 = vector.load %arg9[%c0_13, %c0_14, %c0_15] : memref<4x16x8xbf16, #tpu.memory_space<vmem>>, vector<1x16x8xbf16>
    %14 = vector.shape_cast %13 : vector<1x16x8xbf16> to vector<16x8xbf16>
    %cst_16 = arith.constant dense<0.000000e+00> : vector<8x8xf32>
    %15 = tpu.matmul %6, %14, %cst_16 {dimension_numbers = #tpu.dot_dimension_numbers<[1], [0], [0], [1], [0, 0, 1, 1], [], []>} : vector<8x16xbf16>, vector<16x8xbf16>, vector<8x8xf32> -> vector<8x8xf32>
    %16 = arith.truncf %15 : vector<8x8xf32> to vector<8x8xbf16>
    %c0_17 = arith.constant 0 : index
    %c0_18 = arith.constant 0 : index
    %c0_19 = arith.constant 0 : index
    %17 = vector.load %arg12[%c0_17, %c0_18, %c0_19] : memref<4x8x8xbf16, #tpu.memory_space<vmem>>, vector<1x8x8xbf16>
    %18 = vector.shape_cast %17 : vector<1x8x8xbf16> to vector<8x8xbf16>
    %cst_20 = arith.constant dense<0.000000e+00> : vector<8x8xf32>
    %19 = tpu.matmul %18, %12, %cst_20 {dimension_numbers = #tpu.dot_dimension_numbers<[1], [1], [0], [0], [0, 0, 1, 0], [], []>} : vector<8x8xbf16>, vector<8x8xbf16>, vector<8x8xf32> -> vector<8x8xf32>
    %20 = arith.addf %19, %8 : vector<8x8xf32>
    %c0_21 = arith.constant 0 : index
    %c0_22 = arith.constant 0 : index
    %c0_23 = arith.constant 0 : index
    %21 = vector.load %arg13[%c0_21, %c0_22, %c0_23] : memref<4x8x1xf32, #tpu.memory_space<vmem>>, vector<1x8x1xf32>
    %22 = vector.shape_cast %21 : vector<1x8x1xf32> to vector<8x1xf32>
    %cst_24 = arith.constant dense<0xFF800000> : vector<8xf32>
    %23 = vector.multi_reduction <maximumf>, %20, %cst_24 [1] : vector<8x8xf32> to vector<8xf32>
    %24 = vector.shape_cast %23 : vector<8xf32> to vector<8x1xf32>
    %25 = arith.maximumf %22, %24 : vector<8x1xf32>
    %26 = arith.subf %22, %25 : vector<8x1xf32>
    %27 = math.exp %26 : vector<8x1xf32>
    %28 = vector.broadcast %25 : vector<8x1xf32> to vector<8x8xf32>
    %29 = arith.subf %20, %28 : vector<8x8xf32>
    %30 = math.exp %29 : vector<8x8xf32>
    %c0_25 = arith.constant 0 : index
    %c0_26 = arith.constant 0 : index
    %c0_27 = arith.constant 0 : index
    %31 = vector.load %arg14[%c0_25, %c0_26, %c0_27] : memref<4x8x1xf32, #tpu.memory_space<vmem>>, vector<1x8x1xf32>
    %32 = vector.shape_cast %31 : vector<1x8x1xf32> to vector<8x1xf32>
    %33 = arith.mulf %27, %32 : vector<8x1xf32>
    %cst_28 = arith.constant dense<0.000000e+00> : vector<8xf32>
    %34 = vector.multi_reduction <add>, %30, %cst_28 [1] : vector<8x8xf32> to vector<8xf32>
    %35 = vector.shape_cast %34 : vector<8xf32> to vector<8x1xf32>
    %36 = arith.addf %33, %35 : vector<8x1xf32>
    %c0_29 = arith.constant 0 : index
    %c0_30 = arith.constant 0 : index
    %c0_31 = arith.constant 0 : index
    %37 = vector.load %arg14[%c0_29, %c0_30, %c0_31] : memref<4x8x1xf32, #tpu.memory_space<vmem>>, vector<1x8x1xf32>
    %38 = vector.shape_cast %37 : vector<1x8x1xf32> to vector<8x1xf32>
    %39 = vector.shape_cast %36 : vector<8x1xf32> to vector<1x8x1xf32>
    tpu.vector_store %arg14[%c0_29, %c0_30, %c0_31], %39 {strides = array<i32>} : memref<4x8x1xf32, #tpu.memory_space<vmem>>, vector<1x8x1xf32>,
    %c0_32 = arith.constant 0 : index
    %c0_33 = arith.constant 0 : index
    %c0_34 = arith.constant 0 : index
    %40 = vector.load %arg15[%c0_32, %c0_33, %c0_34] : memref<4x8x8xf32, #tpu.memory_space<vmem>>, vector<1x8x8xf32>
    %41 = vector.shape_cast %40 : vector<1x8x8xf32> to vector<8x8xf32>
    %42 = vector.broadcast %27 : vector<8x1xf32> to vector<8x8xf32>
    %43 = arith.mulf %42, %41 : vector<8x8xf32>
    %44 = arith.truncf %30 : vector<8x8xf32> to vector<8x8xbf16>
    %cst_35 = arith.constant dense<0.000000e+00> : vector<8x8xf32>
    %45 = tpu.matmul %44, %16, %cst_35 {dimension_numbers = #tpu.dot_dimension_numbers<[1], [0], [0], [1], [0, 0, 1, 1], [], []>} : vector<8x8xbf16>, vector<8x8xbf16>, vector<8x8xf32> -> vector<8x8xf32>
    %46 = arith.addf %43, %45 : vector<8x8xf32>
    %c0_36 = arith.constant 0 : index
    %c0_37 = arith.constant 0 : index
    %c0_38 = arith.constant 0 : index
    %47 = vector.load %arg15[%c0_36, %c0_37, %c0_38] : memref<4x8x8xf32, #tpu.memory_space<vmem>>, vector<1x8x8xf32>
    %48 = vector.shape_cast %47 : vector<1x8x8xf32> to vector<8x8xf32>
    %49 = vector.shape_cast %46 : vector<8x8xf32> to vector<1x8x8xf32>
    tpu.vector_store %arg15[%c0_36, %c0_37, %c0_38], %49 {strides = array<i32>} : memref<4x8x8xf32, #tpu.memory_space<vmem>>, vector<1x8x8xf32>,
    %c0_39 = arith.constant 0 : index
    %c0_40 = arith.constant 0 : index
    %c0_41 = arith.constant 0 : index
    %50 = vector.load %arg13[%c0_39, %c0_40, %c0_41] : memref<4x8x1xf32, #tpu.memory_space<vmem>>, vector<1x8x1xf32>
    %51 = vector.shape_cast %50 : vector<1x8x1xf32> to vector<8x1xf32>
    %52 = vector.shape_cast %25 : vector<8x1xf32> to vector<1x8x1xf32>
    tpu.vector_store %arg13[%c0_39, %c0_40, %c0_41], %52 {strides = array<i32>} : memref<4x8x1xf32, #tpu.memory_space<vmem>>, vector<1x8x1xf32>,
    %c0_42 = arith.constant 0 : index
    %c0_43 = arith.constant 0 : index
    %c0_44 = arith.constant 0 : index
    %c0_45 = arith.constant 0 : index
    %53 = vector.load %arg6[%c0_42, %c0_43, %c0_44, %c0_45] : memref<1x1x8x8xf32, #tpu.memory_space<vmem>>, vector<1x1x8x8xf32>
    %54 = vector.shape_cast %53 : vector<1x1x8x8xf32> to vector<8x8xf32>
    %c1 = arith.constant 1 : index
    %c0_46 = arith.constant 0 : index
    %c0_47 = arith.constant 0 : index
    %55 = vector.load %arg8[%c1, %c0_46, %c0_47] : memref<4x16x8xbf16, #tpu.memory_space<vmem>>, vector<1x16x8xbf16>
    %56 = vector.shape_cast %55 : vector<1x16x8xbf16> to vector<16x8xbf16>
    %cst_48 = arith.constant dense<0.000000e+00> : vector<8x8xf32>
    %57 = tpu.matmul %4, %56, %cst_48 {dimension_numbers = #tpu.dot_dimension_numbers<[1], [0], [0], [1], [0, 0, 1, 1], [], []>} : vector<8x16xbf16>, vector<16x8xbf16>, vector<8x8xf32> -> vector<8x8xf32>
    %58 = arith.truncf %57 : vector<8x8xf32> to vector<8x8xbf16>
    %c1_49 = arith.constant 1 : index
    %c0_50 = arith.constant 0 : index
    %c0_51 = arith.constant 0 : index
    %59 = vector.load %arg9[%c1_49, %c0_50, %c0_51] : memref<4x16x8xbf16, #tpu.memory_space<vmem>>, vector<1x16x8xbf16>
    %60 = vector.shape_cast %59 : vector<1x16x8xbf16> to vector<16x8xbf16>
    %cst_52 = arith.constant dense<0.000000e+00> : vector<8x8xf32>
    %61 = tpu.matmul %6, %60, %cst_52 {dimension_numbers = #tpu.dot_dimension_numbers<[1], [0], [0], [1], [0, 0, 1, 1], [], []>} : vector<8x16xbf16>, vector<16x8xbf16>, vector<8x8xf32> -> vector<8x8xf32>
    %62 = arith.truncf %61 : vector<8x8xf32> to vector<8x8xbf16>
    %c1_53 = arith.constant 1 : index
    %c0_54 = arith.constant 0 : index
    %c0_55 = arith.constant 0 : index
    %63 = vector.load %arg12[%c1_53, %c0_54, %c0_55] : memref<4x8x8xbf16, #tpu.memory_space<vmem>>, vector<1x8x8xbf16>
    %64 = vector.shape_cast %63 : vector<1x8x8xbf16> to vector<8x8xbf16>
    %cst_56 = arith.constant dense<0.000000e+00> : vector<8x8xf32>
    %65 = tpu.matmul %64, %58, %cst_56 {dimension_numbers = #tpu.dot_dimension_numbers<[1], [1], [0], [0], [0, 0, 1, 0], [], []>} : vector<8x8xbf16>, vector<8x8xbf16>, vector<8x8xf32> -> vector<8x8xf32>
    %66 = arith.addf %65, %54 : vector<8x8xf32>
    %c1_57 = arith.constant 1 : index
    %c0_58 = arith.constant 0 : index
    %c0_59 = arith.constant 0 : index
    %67 = vector.load %arg13[%c1_57, %c0_58, %c0_59] : memref<4x8x1xf32, #tpu.memory_space<vmem>>, vector<1x8x1xf32>
    %68 = vector.shape_cast %67 : vector<1x8x1xf32> to vector<8x1xf32>
    %cst_60 = arith.constant dense<0xFF800000> : vector<8xf32>
    %69 = vector.multi_reduction <maximumf>, %66, %cst_60 [1] : vector<8x8xf32> to vector<8xf32>
    %70 = vector.shape_cast %69 : vector<8xf32> to vector<8x1xf32>
    %71 = arith.maximumf %68, %70 : vector<8x1xf32>
    %72 = arith.subf %68, %71 : vector<8x1xf32>
    %73 = math.exp %72 : vector<8x1xf32>
    %74 = vector.broadcast %71 : vector<8x1xf32> to vector<8x8xf32>
    %75 = arith.subf %66, %74 : vector<8x8xf32>
    %76 = math.exp %75 : vector<8x8xf32>
    %c1_61 = arith.constant 1 : index
    %c0_62 = arith.constant 0 : index
    %c0_63 = arith.constant 0 : index
    %77 = vector.load %arg14[%c1_61, %c0_62, %c0_63] : memref<4x8x1xf32, #tpu.memory_space<vmem>>, vector<1x8x1xf32>
    %78 = vector.shape_cast %77 : vector<1x8x1xf32> to vector<8x1xf32>
    %79 = arith.mulf %73, %78 : vector<8x1xf32>
    %cst_64 = arith.constant dense<0.000000e+00> : vector<8xf32>
    %80 = vector.multi_reduction <add>, %76, %cst_64 [1] : vector<8x8xf32> to vector<8xf32>
    %81 = vector.shape_cast %80 : vector<8xf32> to vector<8x1xf32>
    %82 = arith.addf %79, %81 : vector<8x1xf32>
    %c1_65 = arith.constant 1 : index
    %c0_66 = arith.constant 0 : index
    %c0_67 = arith.constant 0 : index
    %83 = vector.load %arg14[%c1_65, %c0_66, %c0_67] : memref<4x8x1xf32, #tpu.memory_space<vmem>>, vector<1x8x1xf32>
    %84 = vector.shape_cast %83 : vector<1x8x1xf32> to vector<8x1xf32>
    %85 = vector.shape_cast %82 : vector<8x1xf32> to vector<1x8x1xf32>
    tpu.vector_store %arg14[%c1_65, %c0_66, %c0_67], %85 {strides = array<i32>} : memref<4x8x1xf32, #tpu.memory_space<vmem>>, vector<1x8x1xf32>,
    %c1_68 = arith.constant 1 : index
    %c0_69 = arith.constant 0 : index
    %c0_70 = arith.constant 0 : index
    %86 = vector.load %arg15[%c1_68, %c0_69, %c0_70] : memref<4x8x8xf32, #tpu.memory_space<vmem>>, vector<1x8x8xf32>
    %87 = vector.shape_cast %86 : vector<1x8x8xf32> to vector<8x8xf32>
    %88 = vector.broadcast %73 : vector<8x1xf32> to vector<8x8xf32>
    %89 = arith.mulf %88, %87 : vector<8x8xf32>
    %90 = arith.truncf %76 : vector<8x8xf32> to vector<8x8xbf16>
    %cst_71 = arith.constant dense<0.000000e+00> : vector<8x8xf32>
    %91 = tpu.matmul %90, %62, %cst_71 {dimension_numbers = #tpu.dot_dimension_numbers<[1], [0], [0], [1], [0, 0, 1, 1], [], []>} : vector<8x8xbf16>, vector<8x8xbf16>, vector<8x8xf32> -> vector<8x8xf32>
    %92 = arith.addf %89, %91 : vector<8x8xf32>
    %c1_72 = arith.constant 1 : index
    %c0_73 = arith.constant 0 : index
    %c0_74 = arith.constant 0 : index
    %93 = vector.load %arg15[%c1_72, %c0_73, %c0_74] : memref<4x8x8xf32, #tpu.memory_space<vmem>>, vector<1x8x8xf32>
    %94 = vector.shape_cast %93 : vector<1x8x8xf32> to vector<8x8xf32>
    %95 = vector.shape_cast %92 : vector<8x8xf32> to vector<1x8x8xf32>
    tpu.vector_store %arg15[%c1_72, %c0_73, %c0_74], %95 {strides = array<i32>} : memref<4x8x8xf32, #tpu.memory_space<vmem>>, vector<1x8x8xf32>,
    %c1_75 = arith.constant 1 : index
    %c0_76 = arith.constant 0 : index
    %c0_77 = arith.constant 0 : index
    %96 = vector.load %arg13[%c1_75, %c0_76, %c0_77] : memref<4x8x1xf32, #tpu.memory_space<vmem>>, vector<1x8x1xf32>
    %97 = vector.shape_cast %96 : vector<1x8x1xf32> to vector<8x1xf32>
    %98 = vector.shape_cast %71 : vector<8x1xf32> to vector<1x8x1xf32>
    tpu.vector_store %arg13[%c1_75, %c0_76, %c0_77], %98 {strides = array<i32>} : memref<4x8x1xf32, #tpu.memory_space<vmem>>, vector<1x8x1xf32>,
    %c0_78 = arith.constant 0 : index
    %c0_79 = arith.constant 0 : index
    %c0_80 = arith.constant 0 : index
    %c0_81 = arith.constant 0 : index
    %99 = vector.load %arg6[%c0_78, %c0_79, %c0_80, %c0_81] : memref<1x1x8x8xf32, #tpu.memory_space<vmem>>, vector<1x1x8x8xf32>
    %100 = vector.shape_cast %99 : vector<1x1x8x8xf32> to vector<8x8xf32>
    %c2 = arith.constant 2 : index
    %c0_82 = arith.constant 0 : index
    %c0_83 = arith.constant 0 : index
    %101 = vector.load %arg8[%c2, %c0_82, %c0_83] : memref<4x16x8xbf16, #tpu.memory_space<vmem>>, vector<1x16x8xbf16>
    %102 = vector.shape_cast %101 : vector<1x16x8xbf16> to vector<16x8xbf16>
    %cst_84 = arith.constant dense<0.000000e+00> : vector<8x8xf32>
    %103 = tpu.matmul %4, %102, %cst_84 {dimension_numbers = #tpu.dot_dimension_numbers<[1], [0], [0], [1], [0, 0, 1, 1], [], []>} : vector<8x16xbf16>, vector<16x8xbf16>, vector<8x8xf32> -> vector<8x8xf32>
    %104 = arith.truncf %103 : vector<8x8xf32> to vector<8x8xbf16>
    %c2_85 = arith.constant 2 : index
    %c0_86 = arith.constant 0 : index
    %c0_87 = arith.constant 0 : index
    %105 = vector.load %arg9[%c2_85, %c0_86, %c0_87] : memref<4x16x8xbf16, #tpu.memory_space<vmem>>, vector<1x16x8xbf16>
    %106 = vector.shape_cast %105 : vector<1x16x8xbf16> to vector<16x8xbf16>
    %cst_88 = arith.constant dense<0.000000e+00> : vector<8x8xf32>
    %107 = tpu.matmul %6, %106, %cst_88 {dimension_numbers = #tpu.dot_dimension_numbers<[1], [0], [0], [1], [0, 0, 1, 1], [], []>} : vector<8x16xbf16>, vector<16x8xbf16>, vector<8x8xf32> -> vector<8x8xf32>
    %108 = arith.truncf %107 : vector<8x8xf32> to vector<8x8xbf16>
    %c2_89 = arith.constant 2 : index
    %c0_90 = arith.constant 0 : index
    %c0_91 = arith.constant 0 : index
    %109 = vector.load %arg12[%c2_89, %c0_90, %c0_91] : memref<4x8x8xbf16, #tpu.memory_space<vmem>>, vector<1x8x8xbf16>
    %110 = vector.shape_cast %109 : vector<1x8x8xbf16> to vector<8x8xbf16>
    %cst_92 = arith.constant dense<0.000000e+00> : vector<8x8xf32>
    %111 = tpu.matmul %110, %104, %cst_92 {dimension_numbers = #tpu.dot_dimension_numbers<[1], [1], [0], [0], [0, 0, 1, 0], [], []>} : vector<8x8xbf16>, vector<8x8xbf16>, vector<8x8xf32> -> vector<8x8xf32>
    %112 = arith.addf %111, %100 : vector<8x8xf32>
    %c2_93 = arith.constant 2 : index
    %c0_94 = arith.constant 0 : index
    %c0_95 = arith.constant 0 : index
    %113 = vector.load %arg13[%c2_93, %c0_94, %c0_95] : memref<4x8x1xf32, #tpu.memory_space<vmem>>, vector<1x8x1xf32>
    %114 = vector.shape_cast %113 : vector<1x8x1xf32> to vector<8x1xf32>
    %cst_96 = arith.constant dense<0xFF800000> : vector<8xf32>
    %115 = vector.multi_reduction <maximumf>, %112, %cst_96 [1] : vector<8x8xf32> to vector<8xf32>
    %116 = vector.shape_cast %115 : vector<8xf32> to vector<8x1xf32>
    %117 = arith.maximumf %114, %116 : vector<8x1xf32>
    %118 = arith.subf %114, %117 : vector<8x1xf32>
    %119 = math.exp %118 : vector<8x1xf32>
    %120 = vector.broadcast %117 : vector<8x1xf32> to vector<8x8xf32>
    %121 = arith.subf %112, %120 : vector<8x8xf32>
    %122 = math.exp %121 : vector<8x8xf32>
    %c2_97 = arith.constant 2 : index
    %c0_98 = arith.constant 0 : index
    %c0_99 = arith.constant 0 : index
    %123 = vector.load %arg14[%c2_97, %c0_98, %c0_99] : memref<4x8x1xf32, #tpu.memory_space<vmem>>, vector<1x8x1xf32>
    %124 = vector.shape_cast %123 : vector<1x8x1xf32> to vector<8x1xf32>
    %125 = arith.mulf %119, %124 : vector<8x1xf32>
    %cst_100 = arith.constant dense<0.000000e+00> : vector<8xf32>
    %126 = vector.multi_reduction <add>, %122, %cst_100 [1] : vector<8x8xf32> to vector<8xf32>
    %127 = vector.shape_cast %126 : vector<8xf32> to vector<8x1xf32>
    %128 = arith.addf %125, %127 : vector<8x1xf32>
    %c2_101 = arith.constant 2 : index
    %c0_102 = arith.constant 0 : index
    %c0_103 = arith.constant 0 : index
    %129 = vector.load %arg14[%c2_101, %c0_102, %c0_103] : memref<4x8x1xf32, #tpu.memory_space<vmem>>, vector<1x8x1xf32>
    %130 = vector.shape_cast %129 : vector<1x8x1xf32> to vector<8x1xf32>
    %131 = vector.shape_cast %128 : vector<8x1xf32> to vector<1x8x1xf32>
    tpu.vector_store %arg14[%c2_101, %c0_102, %c0_103], %131 {strides = array<i32>} : memref<4x8x1xf32, #tpu.memory_space<vmem>>, vector<1x8x1xf32>,
    %c2_104 = arith.constant 2 : index
    %c0_105 = arith.constant 0 : index
    %c0_106 = arith.constant 0 : index
    %132 = vector.load %arg15[%c2_104, %c0_105, %c0_106] : memref<4x8x8xf32, #tpu.memory_space<vmem>>, vector<1x8x8xf32>
    %133 = vector.shape_cast %132 : vector<1x8x8xf32> to vector<8x8xf32>
    %134 = vector.broadcast %119 : vector<8x1xf32> to vector<8x8xf32>
    %135 = arith.mulf %134, %133 : vector<8x8xf32>
    %136 = arith.truncf %122 : vector<8x8xf32> to vector<8x8xbf16>
    %cst_107 = arith.constant dense<0.000000e+00> : vector<8x8xf32>
    %137 = tpu.matmul %136, %108, %cst_107 {dimension_numbers = #tpu.dot_dimension_numbers<[1], [0], [0], [1], [0, 0, 1, 1], [], []>} : vector<8x8xbf16>, vector<8x8xbf16>, vector<8x8xf32> -> vector<8x8xf32>
    %138 = arith.addf %135, %137 : vector<8x8xf32>
    %c2_108 = arith.constant 2 : index
    %c0_109 = arith.constant 0 : index
    %c0_110 = arith.constant 0 : index
    %139 = vector.load %arg15[%c2_108, %c0_109, %c0_110] : memref<4x8x8xf32, #tpu.memory_space<vmem>>, vector<1x8x8xf32>
    %140 = vector.shape_cast %139 : vector<1x8x8xf32> to vector<8x8xf32>
    %141 = vector.shape_cast %138 : vector<8x8xf32> to vector<1x8x8xf32>
    tpu.vector_store %arg15[%c2_108, %c0_109, %c0_110], %141 {strides = array<i32>} : memref<4x8x8xf32, #tpu.memory_space<vmem>>, vector<1x8x8xf32>,
    %c2_111 = arith.constant 2 : index
    %c0_112 = arith.constant 0 : index
    %c0_113 = arith.constant 0 : index
    %142 = vector.load %arg13[%c2_111, %c0_112, %c0_113] : memref<4x8x1xf32, #tpu.memory_space<vmem>>, vector<1x8x1xf32>
    %143 = vector.shape_cast %142 : vector<1x8x1xf32> to vector<8x1xf32>
    %144 = vector.shape_cast %117 : vector<8x1xf32> to vector<1x8x1xf32>
    tpu.vector_store %arg13[%c2_111, %c0_112, %c0_113], %144 {strides = array<i32>} : memref<4x8x1xf32, #tpu.memory_space<vmem>>, vector<1x8x1xf32>,
    %c0_114 = arith.constant 0 : index
    %c0_115 = arith.constant 0 : index
    %c0_116 = arith.constant 0 : index
    %c0_117 = arith.constant 0 : index
    %145 = vector.load %arg6[%c0_114, %c0_115, %c0_116, %c0_117] : memref<1x1x8x8xf32, #tpu.memory_space<vmem>>, vector<1x1x8x8xf32>
    %146 = vector.shape_cast %145 : vector<1x1x8x8xf32> to vector<8x8xf32>
    %c3 = arith.constant 3 : index
    %c0_118 = arith.constant 0 : index
    %c0_119 = arith.constant 0 : index
    %147 = vector.load %arg8[%c3, %c0_118, %c0_119] : memref<4x16x8xbf16, #tpu.memory_space<vmem>>, vector<1x16x8xbf16>
    %148 = vector.shape_cast %147 : vector<1x16x8xbf16> to vector<16x8xbf16>
    %cst_120 = arith.constant dense<0.000000e+00> : vector<8x8xf32>
    %149 = tpu.matmul %4, %148, %cst_120 {dimension_numbers = #tpu.dot_dimension_numbers<[1], [0], [0], [1], [0, 0, 1, 1], [], []>} : vector<8x16xbf16>, vector<16x8xbf16>, vector<8x8xf32> -> vector<8x8xf32>
    %150 = arith.truncf %149 : vector<8x8xf32> to vector<8x8xbf16>
    %c3_121 = arith.constant 3 : index
    %c0_122 = arith.constant 0 : index
    %c0_123 = arith.constant 0 : index
    %151 = vector.load %arg9[%c3_121, %c0_122, %c0_123] : memref<4x16x8xbf16, #tpu.memory_space<vmem>>, vector<1x16x8xbf16>
    %152 = vector.shape_cast %151 : vector<1x16x8xbf16> to vector<16x8xbf16>
    %cst_124 = arith.constant dense<0.000000e+00> : vector<8x8xf32>
    %153 = tpu.matmul %6, %152, %cst_124 {dimension_numbers = #tpu.dot_dimension_numbers<[1], [0], [0], [1], [0, 0, 1, 1], [], []>} : vector<8x16xbf16>, vector<16x8xbf16>, vector<8x8xf32> -> vector<8x8xf32>
    %154 = arith.truncf %153 : vector<8x8xf32> to vector<8x8xbf16>
    %c3_125 = arith.constant 3 : index
    %c0_126 = arith.constant 0 : index
    %c0_127 = arith.constant 0 : index
    %155 = vector.load %arg12[%c3_125, %c0_126, %c0_127] : memref<4x8x8xbf16, #tpu.memory_space<vmem>>, vector<1x8x8xbf16>
    %156 = vector.shape_cast %155 : vector<1x8x8xbf16> to vector<8x8xbf16>
    %cst_128 = arith.constant dense<0.000000e+00> : vector<8x8xf32>
    %157 = tpu.matmul %156, %150, %cst_128 {dimension_numbers = #tpu.dot_dimension_numbers<[1], [1], [0], [0], [0, 0, 1, 0], [], []>} : vector<8x8xbf16>, vector<8x8xbf16>, vector<8x8xf32> -> vector<8x8xf32>
    %158 = arith.addf %157, %146 : vector<8x8xf32>
    %c3_129 = arith.constant 3 : index
    %c0_130 = arith.constant 0 : index
    %c0_131 = arith.constant 0 : index
    %159 = vector.load %arg13[%c3_129, %c0_130, %c0_131] : memref<4x8x1xf32, #tpu.memory_space<vmem>>, vector<1x8x1xf32>
    %160 = vector.shape_cast %159 : vector<1x8x1xf32> to vector<8x1xf32>
    %cst_132 = arith.constant dense<0xFF800000> : vector<8xf32>
    %161 = vector.multi_reduction <maximumf>, %158, %cst_132 [1] : vector<8x8xf32> to vector<8xf32>
    %162 = vector.shape_cast %161 : vector<8xf32> to vector<8x1xf32>
    %163 = arith.maximumf %160, %162 : vector<8x1xf32>
    %164 = arith.subf %160, %163 : vector<8x1xf32>
    %165 = math.exp %164 : vector<8x1xf32>
    %166 = vector.broadcast %163 : vector<8x1xf32> to vector<8x8xf32>
    %167 = arith.subf %158, %166 : vector<8x8xf32>
    %168 = math.exp %167 : vector<8x8xf32>
    %c3_133 = arith.constant 3 : index
    %c0_134 = arith.constant 0 : index
    %c0_135 = arith.constant 0 : index
    %169 = vector.load %arg14[%c3_133, %c0_134, %c0_135] : memref<4x8x1xf32, #tpu.memory_space<vmem>>, vector<1x8x1xf32>
    %170 = vector.shape_cast %169 : vector<1x8x1xf32> to vector<8x1xf32>
    %171 = arith.mulf %165, %170 : vector<8x1xf32>
    %cst_136 = arith.constant dense<0.000000e+00> : vector<8xf32>
    %172 = vector.multi_reduction <add>, %168, %cst_136 [1] : vector<8x8xf32> to vector<8xf32>
    %173 = vector.shape_cast %172 : vector<8xf32> to vector<8x1xf32>
    %174 = arith.addf %171, %173 : vector<8x1xf32>
    %c3_137 = arith.constant 3 : index
    %c0_138 = arith.constant 0 : index
    %c0_139 = arith.constant 0 : index
    %175 = vector.load %arg14[%c3_137, %c0_138, %c0_139] : memref<4x8x1xf32, #tpu.memory_space<vmem>>, vector<1x8x1xf32>
    %176 = vector.shape_cast %175 : vector<1x8x1xf32> to vector<8x1xf32>
    %177 = vector.shape_cast %174 : vector<8x1xf32> to vector<1x8x1xf32>
    tpu.vector_store %arg14[%c3_137, %c0_138, %c0_139], %177 {strides = array<i32>} : memref<4x8x1xf32, #tpu.memory_space<vmem>>, vector<1x8x1xf32>,
    %c3_140 = arith.constant 3 : index
    %c0_141 = arith.constant 0 : index
    %c0_142 = arith.constant 0 : index
    %178 = vector.load %arg15[%c3_140, %c0_141, %c0_142] : memref<4x8x8xf32, #tpu.memory_space<vmem>>, vector<1x8x8xf32>
    %179 = vector.shape_cast %178 : vector<1x8x8xf32> to vector<8x8xf32>
    %180 = vector.broadcast %165 : vector<8x1xf32> to vector<8x8xf32>
    %181 = arith.mulf %180, %179 : vector<8x8xf32>
    %182 = arith.truncf %168 : vector<8x8xf32> to vector<8x8xbf16>
    %cst_143 = arith.constant dense<0.000000e+00> : vector<8x8xf32>
    %183 = tpu.matmul %182, %154, %cst_143 {dimension_numbers = #tpu.dot_dimension_numbers<[1], [0], [0], [1], [0, 0, 1, 1], [], []>} : vector<8x8xbf16>, vector<8x8xbf16>, vector<8x8xf32> -> vector<8x8xf32>
    %184 = arith.addf %181, %183 : vector<8x8xf32>
    %c3_144 = arith.constant 3 : index
    %c0_145 = arith.constant 0 : index
    %c0_146 = arith.constant 0 : index
    %185 = vector.load %arg15[%c3_144, %c0_145, %c0_146] : memref<4x8x8xf32, #tpu.memory_space<vmem>>, vector<1x8x8xf32>
    %186 = vector.shape_cast %185 : vector<1x8x8xf32> to vector<8x8xf32>
    %187 = vector.shape_cast %184 : vector<8x8xf32> to vector<1x8x8xf32>
    tpu.vector_store %arg15[%c3_144, %c0_145, %c0_146], %187 {strides = array<i32>} : memref<4x8x8xf32, #tpu.memory_space<vmem>>, vector<1x8x8xf32>,
    %c3_147 = arith.constant 3 : index
    %c0_148 = arith.constant 0 : index
    %c0_149 = arith.constant 0 : index
    %188 = vector.load %arg13[%c3_147, %c0_148, %c0_149] : memref<4x8x1xf32, #tpu.memory_space<vmem>>, vector<1x8x1xf32>
    %189 = vector.shape_cast %188 : vector<1x8x1xf32> to vector<8x1xf32>
    %190 = vector.shape_cast %163 : vector<8x1xf32> to vector<1x8x1xf32>
    tpu.vector_store %arg13[%c3_147, %c0_148, %c0_149], %190 {strides = array<i32>} : memref<4x8x1xf32, #tpu.memory_space<vmem>>, vector<1x8x1xf32>,
    %c0_i32_150 = arith.constant 0 : i32
    %191 = arith.cmpi eq, %arg2, %c0_i32_150 : i32
    %192 = arith.extui %191 : i1 to i32
    %c0_i32_151 = arith.constant 0 : i32
    %193 = arith.cmpi ne, %192, %c0_i32_151 : i32
    scf.if %193 {
      %c0_152 = arith.constant 0 : index
      %c0_153 = arith.constant 0 : index
      %c0_154 = arith.constant 0 : index
      %194 = vector.load %arg3[%c0_152, %c0_153, %c0_154] : memref<1x8x32xf32, #tpu.memory_space<vmem>>, vector<1x8x32xf32>
      %195 = vector.shape_cast %194 : vector<1x8x32xf32> to vector<8x32xf32>
      %c0_155 = arith.constant 0 : index
      %c0_156 = arith.constant 0 : index
      %c0_157 = arith.constant 0 : index
      %196 = vector.load %arg14[%c0_155, %c0_156, %c0_157] : memref<4x8x1xf32, #tpu.memory_space<vmem>>, vector<1x8x1xf32>
      %197 = vector.shape_cast %196 : vector<1x8x1xf32> to vector<8x1xf32>
      %198 = tpu.reciprocal %197 {approx = true} : vector<8x1xf32> -> vector<8x1xf32>
      %c0_158 = arith.constant 0 : index
      %c0_159 = arith.constant 0 : index
      %c0_160 = arith.constant 0 : index
      %199 = vector.load %arg15[%c0_158, %c0_159, %c0_160] : memref<4x8x8xf32, #tpu.memory_space<vmem>>, vector<1x8x8xf32>
      %200 = vector.shape_cast %199 : vector<1x8x8xf32> to vector<8x8xf32>
      %201 = vector.broadcast %198 : vector<8x1xf32> to vector<8x8xf32>
      %202 = arith.mulf %200, %201 : vector<8x8xf32>
      %203 = arith.truncf %202 : vector<8x8xf32> to vector<8x8xbf16>
      %c0_161 = arith.constant 0 : index
      %c0_162 = arith.constant 0 : index
      %c0_163 = arith.constant 0 : index
      %204 = vector.load %arg10[%c0_161, %c0_162, %c0_163] : memref<4x8x32xbf16, #tpu.memory_space<vmem>>, vector<1x8x32xbf16>
      %205 = vector.shape_cast %204 : vector<1x8x32xbf16> to vector<8x32xbf16>
      %cst_164 = arith.constant dense<0.000000e+00> : vector<8x32xf32>
      %206 = tpu.matmul %203, %205, %cst_164 {dimension_numbers = #tpu.dot_dimension_numbers<[1], [0], [0], [1], [0, 0, 1, 1], [], []>} : vector<8x8xbf16>, vector<8x32xbf16>, vector<8x32xf32> -> vector<8x32xf32>
      %207 = arith.addf %195, %206 : vector<8x32xf32>
      %c1_165 = arith.constant 1 : index
      %c0_166 = arith.constant 0 : index
      %c0_167 = arith.constant 0 : index
      %208 = vector.load %arg14[%c1_165, %c0_166, %c0_167] : memref<4x8x1xf32, #tpu.memory_space<vmem>>, vector<1x8x1xf32>
      %209 = vector.shape_cast %208 : vector<1x8x1xf32> to vector<8x1xf32>
      %210 = tpu.reciprocal %209 {approx = true} : vector<8x1xf32> -> vector<8x1xf32>
      %c1_168 = arith.constant 1 : index
      %c0_169 = arith.constant 0 : index
      %c0_170 = arith.constant 0 : index
      %211 = vector.load %arg15[%c1_168, %c0_169, %c0_170] : memref<4x8x8xf32, #tpu.memory_space<vmem>>, vector<1x8x8xf32>
      %212 = vector.shape_cast %211 : vector<1x8x8xf32> to vector<8x8xf32>
      %213 = vector.broadcast %210 : vector<8x1xf32> to vector<8x8xf32>
      %214 = arith.mulf %212, %213 : vector<8x8xf32>
      %215 = arith.truncf %214 : vector<8x8xf32> to vector<8x8xbf16>
      %c1_171 = arith.constant 1 : index
      %c0_172 = arith.constant 0 : index
      %c0_173 = arith.constant 0 : index
      %216 = vector.load %arg10[%c1_171, %c0_172, %c0_173] : memref<4x8x32xbf16, #tpu.memory_space<vmem>>, vector<1x8x32xbf16>
      %217 = vector.shape_cast %216 : vector<1x8x32xbf16> to vector<8x32xbf16>
      %cst_174 = arith.constant dense<0.000000e+00> : vector<8x32xf32>
      %218 = tpu.matmul %215, %217, %cst_174 {dimension_numbers = #tpu.dot_dimension_numbers<[1], [0], [0], [1], [0, 0, 1, 1], [], []>} : vector<8x8xbf16>, vector<8x32xbf16>, vector<8x32xf32> -> vector<8x32xf32>
      %219 = arith.addf %207, %218 : vector<8x32xf32>
      %c2_175 = arith.constant 2 : index
      %c0_176 = arith.constant 0 : index
      %c0_177 = arith.constant 0 : index
      %220 = vector.load %arg14[%c2_175, %c0_176, %c0_177] : memref<4x8x1xf32, #tpu.memory_space<vmem>>, vector<1x8x1xf32>
      %221 = vector.shape_cast %220 : vector<1x8x1xf32> to vector<8x1xf32>
      %222 = tpu.reciprocal %221 {approx = true} : vector<8x1xf32> -> vector<8x1xf32>
      %c2_178 = arith.constant 2 : index
      %c0_179 = arith.constant 0 : index
      %c0_180 = arith.constant 0 : index
      %223 = vector.load %arg15[%c2_178, %c0_179, %c0_180] : memref<4x8x8xf32, #tpu.memory_space<vmem>>, vector<1x8x8xf32>
      %224 = vector.shape_cast %223 : vector<1x8x8xf32> to vector<8x8xf32>
      %225 = vector.broadcast %222 : vector<8x1xf32> to vector<8x8xf32>
      %226 = arith.mulf %224, %225 : vector<8x8xf32>
      %227 = arith.truncf %226 : vector<8x8xf32> to vector<8x8xbf16>
      %c2_181 = arith.constant 2 : index
      %c0_182 = arith.constant 0 : index
      %c0_183 = arith.constant 0 : index
      %228 = vector.load %arg10[%c2_181, %c0_182, %c0_183] : memref<4x8x32xbf16, #tpu.memory_space<vmem>>, vector<1x8x32xbf16>
      %229 = vector.shape_cast %228 : vector<1x8x32xbf16> to vector<8x32xbf16>
      %cst_184 = arith.constant dense<0.000000e+00> : vector<8x32xf32>
      %230 = tpu.matmul %227, %229, %cst_184 {dimension_numbers = #tpu.dot_dimension_numbers<[1], [0], [0], [1], [0, 0, 1, 1], [], []>} : vector<8x8xbf16>, vector<8x32xbf16>, vector<8x32xf32> -> vector<8x32xf32>
      %231 = arith.addf %219, %230 : vector<8x32xf32>
      %c3_185 = arith.constant 3 : index
      %c0_186 = arith.constant 0 : index
      %c0_187 = arith.constant 0 : index
      %232 = vector.load %arg14[%c3_185, %c0_186, %c0_187] : memref<4x8x1xf32, #tpu.memory_space<vmem>>, vector<1x8x1xf32>
      %233 = vector.shape_cast %232 : vector<1x8x1xf32> to vector<8x1xf32>
      %234 = tpu.reciprocal %233 {approx = true} : vector<8x1xf32> -> vector<8x1xf32>
      %c3_188 = arith.constant 3 : index
      %c0_189 = arith.constant 0 : index
      %c0_190 = arith.constant 0 : index
      %235 = vector.load %arg15[%c3_188, %c0_189, %c0_190] : memref<4x8x8xf32, #tpu.memory_space<vmem>>, vector<1x8x8xf32>
      %236 = vector.shape_cast %235 : vector<1x8x8xf32> to vector<8x8xf32>
      %237 = vector.broadcast %234 : vector<8x1xf32> to vector<8x8xf32>
      %238 = arith.mulf %236, %237 : vector<8x8xf32>
      %239 = arith.truncf %238 : vector<8x8xf32> to vector<8x8xbf16>
      %c3_191 = arith.constant 3 : index
      %c0_192 = arith.constant 0 : index
      %c0_193 = arith.constant 0 : index
      %240 = vector.load %arg10[%c3_191, %c0_192, %c0_193] : memref<4x8x32xbf16, #tpu.memory_space<vmem>>, vector<1x8x32xbf16>
      %241 = vector.shape_cast %240 : vector<1x8x32xbf16> to vector<8x32xbf16>
      %cst_194 = arith.constant dense<0.000000e+00> : vector<8x32xf32>
      %242 = tpu.matmul %239, %241, %cst_194 {dimension_numbers = #tpu.dot_dimension_numbers<[1], [0], [0], [1], [0, 0, 1, 1], [], []>} : vector<8x8xbf16>, vector<8x32xbf16>, vector<8x32xf32> -> vector<8x32xf32>
      %243 = arith.addf %231, %242 : vector<8x32xf32>
      %c0_195 = arith.constant 0 : index
      %c0_196 = arith.constant 0 : index
      %c0_197 = arith.constant 0 : index
      %244 = vector.load %arg11[%c0_195, %c0_196, %c0_197] : memref<1x8x32xf32, #tpu.memory_space<vmem>>, vector<1x8x32xf32>
      %245 = vector.shape_cast %244 : vector<1x8x32xf32> to vector<8x32xf32>
      %246 = vector.shape_cast %243 : vector<8x32xf32> to vector<1x8x32xf32>
      tpu.vector_store %arg11[%c0_195, %c0_196, %c0_197], %246 {strides = array<i32>} : memref<1x8x32xf32, #tpu.memory_space<vmem>>, vector<1x8x32xf32>,
    } else {
    }
    return
  }
  func.func @transform_0(%arg0: i32, %arg1: i32, %arg2: i32) -> (i32, i32, i32) {
    %c0_i32 = arith.constant 0 : i32
    %c0_i32_0 = arith.constant 0 : i32
    return %arg0, %arg1, %c0_i32 : i32, i32, i32
  }
  func.func @transform_1(%arg0: i32, %arg1: i32, %arg2: i32) -> (i32, i32, i32) {
    %c0_i32 = arith.constant 0 : i32
    %c0_i32_0 = arith.constant 0 : i32
    return %arg0, %arg2, %c0_i32 : i32, i32, i32
  }
  func.func @transform_2(%arg0: i32, %arg1: i32, %arg2: i32) -> (i32, i32, i32) {
    %c0_i32 = arith.constant 0 : i32
    %c0_i32_0 = arith.constant 0 : i32
    return %arg0, %arg2, %c0_i32 : i32, i32, i32
  }
  func.func @transform_3(%arg0: i32, %arg1: i32, %arg2: i32) -> (i32, i32, i32, i32) {
    %c0_i32 = arith.constant 0 : i32
    %c0_i32_0 = arith.constant 0 : i32
    %c0_i32_1 = arith.constant 0 : i32
    return %c0_i32, %c0_i32_0, %arg1, %arg2 : i32, i32, i32, i32
  }
  func.func @transform_4(%arg0: i32, %arg1: i32, %arg2: i32) -> (i32, i32, i32) {
    %c0_i32 = arith.constant 0 : i32
    %c0_i32_0 = arith.constant 0 : i32
    %c0_i32_1 = arith.constant 0 : i32
    %c0_i32_2 = arith.constant 0 : i32
    return %c0_i32, %c0_i32_0, %c0_i32_1 : i32, i32, i32
  }
  func.func @transform_5(%arg0: i32, %arg1: i32, %arg2: i32) -> (i32, i32, i32) {
    %c0_i32 = arith.constant 0 : i32
    %c0_i32_0 = arith.constant 0 : i32
    %c0_i32_1 = arith.constant 0 : i32
    %c0_i32_2 = arith.constant 0 : i32
    return %c0_i32, %c0_i32_0, %c0_i32_1 : i32, i32, i32
  }
  func.func @transform_6(%arg0: i32, %arg1: i32, %arg2: i32) -> (i32, i32, i32) {
    %c0_i32 = arith.constant 0 : i32
    %c0_i32_0 = arith.constant 0 : i32
    %c0_i32_1 = arith.constant 0 : i32
    %c0_i32_2 = arith.constant 0 : i32
    return %c0_i32, %c0_i32_0, %c0_i32_1 : i32, i32, i32
  }
  func.func @transform_7(%arg0: i32, %arg1: i32, %arg2: i32) -> (i32, i32, i32) {
    %c0_i32 = arith.constant 0 : i32
    %c0_i32_0 = arith.constant 0 : i32
    %c0_i32_1 = arith.constant 0 : i32
    %c0_i32_2 = arith.constant 0 : i32
    return %c0_i32, %c0_i32_0, %c0_i32_1 : i32, i32, i32
  }
  func.func @transform_8(%arg0: i32, %arg1: i32, %arg2: i32) -> (i32, i32, i32) {
    %c0_i32 = arith.constant 0 : i32
    %c0_i32_0 = arith.constant 0 : i32
    return %arg0, %arg1, %c0_i32 : i32, i32, i32
  }
}

</mosaic_0001>

<bundles_post_ra>
// kernel: multi_head_attention.1
= control target key start
LH: loop header
LB: loop body
LE: loop exit
PB: predicated region body
PF: predicated region fallthrough
CT: control target
= control target key end

     0   :  { %13 = vsyncpa [#allocation7], 0  ;;  %s2951_s0 = inlined_call_operand.vmem [shape: f32[2,8,32], index: 0, kind: input, shape index: {}]   ;;  %s2952_s1 = inlined_call_operand.vmem [shape: bf16[2,8,16], index: 1, kind: input, shape index: {}]   ;;  %s2953_s2 = inlined_call_operand.vmem [shape: bf16[2,8,16], index: 2, kind: input, shape index: {}]   ;;  %s2954_s3 = inlined_call_operand.vmem [shape: f32[1,1,8,8], index: 3, kind: input, shape index: {}]   ;;  %s2955_s4 = inlined_call_operand.vmem [shape: bf16[4,32,8], index: 4, kind: input, shape index: {}]   ;;  %s2956_s5 = inlined_call_operand.vmem [shape: bf16[4,16,8], index: 5, kind: input, shape index: {}]   ;;  %s2957_s6 = inlined_call_operand.vmem [shape: bf16[4,16,8], index: 6, kind: input, shape index: {}]   ;;  %s2958_s7 = inlined_call_operand.vmem [shape: bf16[4,8,32], index: 7, kind: input, shape index: {}]   ;;  %s2959_s8 = inlined_call_operand.hbm [shape: f32[2,8,32], index: 8, kind: output, shape index: {}]  }
   0x1   :  { %15 = vsyncpa [#allocation7 + $0x1], 0  ;;  %s2522_s27 = smov 0   ;;  %s2524_s28 = smov 0  }
   0x2   :  { %s2526_s29 = smov 0   ;;  %s2528_s30 = smov 0  }
   0x3   :  { %s2530_s9 = smov 0   ;;  %s2532_s10 = smov 0  }
   0x4 LB: > { %s1993_s11 = sadd.s32 4294967295, %s2470_s10   ;;  %s1994_s12 = sadd.s32 4294967294, %s2470_s10   ;;  %s2470_s10 = sphi %s2532_s10, %s21_s10   ;;  %s2466_s9 = sphi %s2530_s9, %s2966_s9   ;;  %s2462_s30 = sphi %s2528_s30, %s2965_s30   ;;  %s2458_s29 = sphi %s2526_s29, %s2964_s29   ;;  %s2454_s28 = sphi %s2524_s28, %s2963_s28   ;;  %s2450_s27 = sphi %s2522_s27, %s2962_s27  }
   0x5   : > { %s40_s13 = sadd.s32 1, %s2466_s9  ;;  %s245_s14 = sadd.s32 1, %s2458_s29 }
   0x6   : > { %p42_p0 = scmp.ge.s32.totalorder %s40_s13, 2  ;;  %p255_p1 = scmp.ne.s32.totalorder %s2458_s29, %s2454_s28 }
   0x7   : > { %p256_p2 = scmp.eq.s32.totalorder %s1993_s11, 1  ;;  %p261_p3 = scmp.ne.s32.totalorder %s2454_s28, %s2450_s27 }
   0x8   : > { %s2968_s13 = smov (%p42_p0, %s40_s13), 0  ;;  %p262_p5 = scmp.eq.s32.totalorder %s1994_s12, 1 }
   0x9   : > { %p2562_p4 = por %p256_p2, %p255_p1  ;;  %s240_s16 = ssub.s32 %s2466_s9, %s2968_s13 }
   0xa   : > { %p1998_p6 = scmp.ge.s32.totalorder %s2470_s10, 1  ;;  %p243_p7 = scmp.eq.s32.totalorder %s240_s16, 0 }
   0xb   : > { %p2569_p8 = por %p262_p5, %p261_p3  ;;  %p332_p9 = scmp.lt.s32.totalorder %s2470_s10, 3 }
   0xc   : > { %s2575_s18 = scalar_select %p243_p7, %s2458_s29, %s245_s14  }
   0xd   : > { %p333_p10 = pnand %p1998_p6, %p332_p9 }
   0xe   : > { %v2352_v0 = vld [vmem:[%s2955_s4] sm:$0xff] (!%p333_p10)   ;;  %v2472_v1 = vmov (!%p333_p10), 0.0   ;;  %vm2473_vm0 = vmmov (!%p333_p10), 0   ;;  %v2354_v3 = vld [vmem:[%s2955_s4 + $0x8] sm:$0xff] (!%p333_p10)   ;;  %p389_p11 = scmp.lt.s32.totalorder (!%p333_p10), %s2462_s30, 1  ;;  %vm676_vm1 = vcmask (!%p333_p10), 64512  }
   0xf   : > { %336 = sbr.rel (%p333_p10) target bundleno = 1968 (0x7b0), region = 52  ;;  %2126 = vmatprep.subr.bf16.mxu1 (!%p333_p10), %v2472_v1  ;;  %2158 = vmatprep.subr.bf16.mxu0 (!%p333_p10), %v2472_v1  ;;  %v2353_v2 = vld [vmem:[%s2956_s5] sm:$0xff] (!%p333_p10)   ;;  %vm692_vm2 = vcmask (!%p333_p10), 130048   ;;  %677 = vst.msk [vmem:[#allocation5] sm:$0xff] (!%p333_p10), %vm676_vm1, %v2472_v1  ;;  %678 = vst.msk [vmem:[#allocation5 + $0x8] sm:$0xff] (!%p333_p10), %vm676_vm1, %v2472_v1  ;;  %vm440_vm3 = vcmask (!%p333_p10), 261120  }
  0x10   : > { %2127 = vmatpush3.bf16.msra.mxu1 (!%p333_p10), %v2352_v0  ;;  %2160 = vmatprep.mubr.msk.bf16.mxu0 (!%p333_p10), %vm2473_vm0, %v2472_v1  ;;  %679 = vst.msk [vmem:[#allocation5 + $0x10] sm:$0xff] (!%p333_p10), %vm676_vm1, %v2472_v1  ;;  %680 = vst.msk [vmem:[#allocation5 + $0x18] sm:$0xff] (!%p333_p10), %vm676_vm1, %v2472_v1  ;;  %v2355_v7 = vld [vmem:[%s2955_s4 + $0x10] sm:$0xff] (!%p333_p10)   ;;  %v2357_v8 = vld [vmem:[%s2955_s4 + $0x18] sm:$0xff] (!%p333_p10)   ;;  %vm485_vm4 = vcmask (!%p333_p10), 60416   ;;  %vm667_vm5 = vcmask (!%p333_p10), 7168  }
  0x11   : > { %2159 = vmatpush3.bf16.msra.mxu0 (!%p333_p10), %v2353_v2  ;;  %2128 = vmatprep.subr.bf16.mxu1 (!%p333_p10), %v2472_v1  ;;  %v2356_v20 = vld [vmem:[%s2956_s5 + $0x8] sm:$0xff] (!%p333_p10)   ;;  %v2358_v27 = vld [vmem:[%s2955_s4 + $0x20] sm:$0xff] (!%p333_p10)   ;;  %v2361_v29 = vld [vmem:[%s2955_s4 + $0x30] sm:$0xff] (!%p333_p10)   ;;  %v2474_v30 = vmov (!%p333_p10), -1e+30   ;;  %672 = vst.msk [vmem:[#allocation4] sm:$0xff] (!%p333_p10), %vm667_vm5, %v2472_v1 }
  0x12   : > { %2130 = vmatprep.mubr.msk.bf16.mxu1 (!%p333_p10), %vm2473_vm0, %v2472_v1  ;;  %2170 = vmatprep.subr.bf16.mxu0 (!%p333_p10), %v2472_v1  ;;  %v2360_v28 = vld [vmem:[%s2955_s4 + $0x28] sm:$0xff] (!%p333_p10)   ;;  %668 = vst.msk [vmem:[#allocation3] sm:$0xff] (!%p333_p10), %vm667_vm5, %v2474_v30  ;;  %669 = vst.msk [vmem:[#allocation3 + $0x8] sm:$0xff] (!%p333_p10), %vm667_vm5, %v2474_v30  ;;  %v2362_v31 = vld [vmem:[%s2955_s4 + $0x38] sm:$0xff] (!%p333_p10)   ;;  %v2475_v49 = vmov (!%p333_p10), 0   ;;  %vm872_vm6 = vcmask (!%p333_p10), 1043456  }
  0x13   : > { %670 = vst.msk [vmem:[#allocation3 + $0x10] sm:$0xff] (!%p333_p10), %vm667_vm5, %v2474_v30  ;;  %671 = vst.msk [vmem:[#allocation3 + $0x18] sm:$0xff] (!%p333_p10), %vm667_vm5, %v2474_v30  ;;  %v2363_v32 = vld [vmem:[%s2957_s6] sm:$0xff] (!%p333_p10)   ;;  %v2359_v48 = vld [vmem:[%s2956_s5 + $0x10] sm:$0xff] (!%p333_p10)   ;;  %2350 = vset.pattern.permute.xlu0 (!%p333_p10), %v2475_v49  ;;  %2351 = vset.pattern.permute.xlu1 (!%p333_p10), %v2475_v49  ;;  %s386_s14 = sand.u32 (!%p333_p10), 1, %s2454_s28   ;;  %s2071_s19 = sshll.u32 (!%p333_p10), %s2462_s30, 7 }
  0x14   : > { %2129 = vmatpush3.bf16.msra.mxu1 (!%p333_p10), %v2354_v3  ;;  %673 = vst.msk [vmem:[#allocation4 + $0x8] sm:$0xff] (!%p333_p10), %vm667_vm5, %v2472_v1  ;;  %674 = vst.msk [vmem:[#allocation4 + $0x10] sm:$0xff] (!%p333_p10), %vm667_vm5, %v2472_v1  ;;  %v2714_v34 = vld [vmem:[%s2954_s3] sm:$0xff] (!%p333_p10)  ;;  %s2476_s24 = smov (!%p333_p10), [#allocation6]  }
  0x15   : > { %2134 = vmatprep.subr.bf16.mxu1 (!%p333_p10), %v2472_v1  ;;  %675 = vst.msk [vmem:[#allocation4 + $0x18] sm:$0xff] (!%p333_p10), %vm667_vm5, %v2472_v1 }
  0x16   : > { %s2593_s25 = scalar_select %p389_p11, %s2462_s30, 1 }
  0x17   : > { %s1857_s30 = scalar_lea.sflag [#allocation7], %s386_s14 }
  0x18   : > { %s2000_s26 = sshll.u32 %s2593_s25, 3  ;;  %s2001_s11 = sshll.u32 %s2593_s25, 2 }
  0x19   : > { %s402_s16 = scalar_lea.vmem %s2952_s1, %s2001_s11  ;;  %s395_s21 = scalar_lea.vmem %s2951_s0, %s2000_s26  ;;  %v2735_v55 = vld [vmem:[#allocation3] sm:$0xff] }
  0x1a   : > { %v2614_v4 = vld [vmem:[%s402_s16] sm:$0xf]  ;;  %s409_s20 = scalar_lea.vmem %s2953_s2, %s2001_s11  ;;  %s1999_s16 = sshll.u32 %s386_s14, 3 }
  0x1b   : > { %2161 = vmatmul.mubr.msk.bf16.vlgmr.msra.gmra.mrb[0].mxu0 %vm692_vm2, %v2614_v4  ;;  %v2621_v5 = vld [vmem:[%s395_s21] sm:$0xff]  ;;  %s2903_s11 = scalar_lea.hbm %s2959_s8, %s2071_s19  ;;  %s2396_s26 = sshll.u32 %s2476_s24, 4  ;;  %s2397_s26 = int_to_ptr.vmem [resolvable:$false] %s2396_s26 }
  0x1c   : > { %v2625_v6 = vpack.c.bf16 %v2621_v5, %v2621_v5  ;;  %2172 = vmatprep.mubr.msk.bf16.mxu0 %vm2473_vm0, %v2472_v1  ;;  %v2705_v33 = vld [vmem:[%s409_s20] sm:$0xf]  ;;  %s388_s20 = scalar_lea.vmem [#allocation6], %s1999_s16  ;;  %s2398_s12 = scalar_lea.vmem %s2397_s26, 256 }
  0x1d   : > { %s1871_s21 = sshll.u32 %s388_s20, 4  ;;  %s2905_s21 = int_to_ptr.vmem [resolvable:$true] %s1871_s21 }
  0x1e   : > { %2131 = vmatmul.mubr.msk.bf16.vlgmr.msra.gmra.mrb[0].mxu1 %vm440_vm3, %v2625_v6  ;;  %s2392_s23 = scalar_lea.vmem %s2905_s21, 128  ;;  %p2399_p1 = scmp.lt.s32.totalorder %s2905_s21, %s2397_s26 }
  0x1f   : > { %2138 = vmatprep.mubr.msk.bf16.mxu1 %vm2473_vm0, %v2472_v1  ;;  %2135 = vmatpush3.bf16.msra.mxu1 %v2355_v7  ;;  %p2393_p12 = scmp.ne.s32.totalorder %s2905_s21, %s2392_s23  ;;  %p2400_p2 = scmp.lt.s32.totalorder %s2398_s12, %s2392_s23 }
  0x20   : > { %2136 = vmatprep.subr.bf16.mxu1 %v2472_v1 }
  0x21   : > { %p2394_p13 = pnand %p2393_p12, %p2562_p4  ;;  %p2401_p3 = por %p2400_p2, %p2399_p1 }
  0x23   : > { %2137 = vmatpush3.bf16.msra.mxu1 %v2357_v8  ;;  %p2395_p0 = pneg %p2394_p13 }
  0x24   : > { %2142 = vmatprep.subr.bf16.mxu1 %v2472_v1 }
  0x25   : > { %p2402_p5 = pnand %p2401_p3, %p2395_p0 }
  0x26   : > { %2139 = vmatmul.mubr.msk.bf16.vlgmr.msra.gmra.mrb[4].mxu1 %vm440_vm3, %v2625_v6 }
  0x27   : > { %2146 = vmatprep.mubr.msk.bf16.mxu1 %vm2473_vm0, %v2472_v1  ;;  %2143 = vmatpush3.bf16.msra.mxu1 %v2358_v27  ;;  %v2365_v27 = vld [vmem:[%s2957_s6 + $0x8] sm:$0xff]  }
  0x28   : > { %2144 = vmatprep.subr.bf16.mxu1 %v2472_v1 }
  0x2b   : > { %2145 = vmatpush3.bf16.msra.mxu1 %v2360_v28 }
  0x2c   : > { %2150 = vmatprep.subr.bf16.mxu1 %v2472_v1 }
  0x2e   : > { %2147 = vmatmul.mubr.msk.bf16.vlgmr.msra.gmra.mrb[8].mxu1 %vm440_vm3, %v2625_v6 }
  0x2f   : > { %2154 = vmatprep.mubr.msk.bf16.mxu1 %vm2473_vm0, %v2472_v1  ;;  %2151 = vmatpush3.bf16.msra.mxu1 %v2361_v29 }
  0x30   : > { %2152 = vmatprep.subr.bf16.mxu1 %v2472_v1 }
  0x33   : > { %2153 = vmatpush3.bf16.msra.mxu1 %v2362_v31 }
  0x34   : > { %2164 = vmatprep.subr.bf16.mxu1 %v2472_v1 }
  0x36   : > { %2155 = vmatmul.mubr.msk.bf16.vlgmr.msra.gmra.mrb[12].mxu1 %vm440_vm3, %v2625_v6 }
  0x37   : > { %2165 = vmatpush3.bf16.msra.mxu1 %v2363_v32  ;;  %2166 = vmatprep.mubr.msk.bf16.mxu1 %vm2473_vm0, %v2472_v1 }
  0x38   : > { %2176 = vmatprep.subr.bf16.mxu1 %v2472_v1 }
  0x3e   : > { %2167 = vmatmul.mubr.msk.bf16.vlgmr.msra.gmra.mrb[16].mxu1 %vm692_vm2, %v2705_v33 }
  0x3f   : > { %2178 = vmatprep.mubr.msk.bf16.mxu1 %vm2473_vm0, %v2472_v1 }
  0xee   : > { %v730_v9 = vpop.f32.mrb[0].mxu0 }
  0xef   : > { %v736_v10 = vpack.c.bf16 %v730_v9, %v730_v9  ;;  %v2162_v11 = vpop.f32.mrb[1].mxu0 }
  0xf0   : > { %v733_v12 = vpop.f32.mrb[2].mxu0 }
  0xf1   : > { %v795_v13 = vsel %vm676_vm1, %v736_v10, 0  ;;  %v478_v14 = vpop.f32.mrb[0].mxu1  ;;  %v2163_v15 = vpop.f32.mrb[3].mxu0 }
  0xf2   : > { %v484_v16 = vpack.c.bf16 %v478_v14, %v478_v14  ;;  %v2132_v17 = vpop.f32.mrb[1].mxu1  ;;  %2171 = vmatpush3.bf16.xpose.msra.mxu0 %v795_v13 }
  0xf3   : > { %v481_v18 = vpop.f32.mrb[2].mxu1  ;;  %2182 = vmatprep.subr.bf16.mxu0 %v2472_v1 }
  0xf4   : > { %486 = vst.msk [vmem:[#allocation2] sm:$0xf] %vm485_vm4, %v484_v16  ;;  %v2133_v19 = vpop.f32.mrb[3].mxu1 }
  0xf9   : > { %v538_v22 = vpop.f32.mrb[4].mxu1 }
  0xfa   : > { %v544_v23 = vpack.c.bf16 %v538_v22, %v538_v22  ;;  %v2140_v24 = vpop.f32.mrb[5].mxu1  ;;  %v2364_v22 = vld [vmem:[%s2956_s5 + $0x18] sm:$0xff]  }
  0xfb   : > { %v789_v21 = vld [vmem:[#allocation2] sm:$0xf]  ;;  %v541_v25 = vpop.f32.mrb[6].mxu1 }
  0xfc   : > { %2173 = vmatmul.mubr.msk.bf16.vlgmr.msra.gmra.mrb[4].mxu0 %vm676_vm1, %v789_v21  ;;  %546 = vst.msk [vmem:[#allocation2 + $0x4] sm:$0xf] %vm485_vm4, %v544_v23  ;;  %v2141_v26 = vpop.f32.mrb[7].mxu1 }
  0xfd   : > { %2183 = vmatpush3.bf16.msra.mxu0 %v2356_v20  ;;  %2184 = vmatprep.mubr.msk.bf16.mxu0 %vm2473_vm0, %v2472_v1 }
  0xfe   : > { %2194 = vmatprep.subr.bf16.mxu0 %v2472_v1 }
 0x101   : > { %v598_v50 = vpop.f32.mrb[8].mxu1 }
 0x102   : > { %v604_v51 = vpack.c.bf16 %v598_v50, %v598_v50  ;;  %v2148_v52 = vpop.f32.mrb[9].mxu1 }
 0x103   : > { %v1021_v47 = vld [vmem:[#allocation2 + $0x4] sm:$0xf]  ;;  %v601_v53 = vpop.f32.mrb[10].mxu1 }
 0x104   : > { %2185 = vmatmul.mubr.msk.bf16.vlgmr.msra.gmra.mrb[8].mxu0 %vm692_vm2, %v2614_v4  ;;  %606 = vst.msk [vmem:[#allocation2 + $0x8] sm:$0xf] %vm485_vm4, %v604_v51  ;;  %v2149_v54 = vpop.f32.mrb[11].mxu1 }
 0x105   : > { %2196 = vmatprep.mubr.msk.bf16.mxu0 %vm2473_vm0, %v2472_v1 }
 0x109   : > { %v658_v59 = vpop.f32.mrb[12].mxu1 }
 0x10a   : > { %v664_v60 = vpack.c.bf16 %v658_v59, %v658_v59  ;;  %v2156_v61 = vpop.f32.mrb[13].mxu1 }
 0x10b   : > { %v661_v62 = vpop.f32.mrb[14].mxu1  ;;  %v1253_v21 = vld [vmem:[#allocation2 + $0x8] sm:$0xf] }
 0x10c   : > { %666 = vst.msk [vmem:[#allocation2 + $0xc] sm:$0xf] %vm485_vm4, %v664_v60  ;;  %v2157_v63 = vpop.f32.mrb[15].mxu1 }
 0x111   : > { %v782_v0 = vpop.f32.mrb[16].mxu1 }
 0x112   : > { %v788_v2 = vpack.c.bf16 %v782_v0, %v782_v0  ;;  %v2168_v3 = vpop.f32.mrb[17].mxu1  ;;  %v2366_v0 = vld [vmem:[%s2957_s6 + $0x10] sm:$0xff]  }
 0x113   : > { %v785_v6 = vpop.f32.mrb[18].mxu1  ;;  %v1301_v3 = vld [vmem:[#allocation3 + $0x10] sm:$0xff] }
 0x114   : > { %v874_v7 = vsel %vm872_vm6, %v788_v2, 0  ;;  %v2169_v8 = vpop.f32.mrb[19].mxu1 }
 0x115   : > { %2177 = vmatpush3.bf16.msra.mxu1 %v874_v7 }
 0x116   : > { %2188 = vmatprep.subr.bf16.mxu1 %v2472_v1 }
 0x1cf   : > { %v831_v35 = vpop.f32.mrb[4].mxu0 }
 0x1d0   : > { %v2717_v36 = vadd.f32 %v831_v35, %v2714_v34  ;;  %v2174_v37 = vpop.f32.mrb[5].mxu0 }
 0x1d1   : > { %v834_v38 = vpop.f32.mrb[6].mxu0 }
 0x1d2   : > { %v2175_v39 = vpop.f32.mrb[7].mxu0  ;;  %v838_v40 = vsel %vm676_vm1, %v2717_v36, -inf }
 0x1d3   : > { %839 = vmax.xlane.f32.xlu0 %v838_v40 }
 0x1d7   : > { %v963_v41 = vpop.f32.mrb[8].mxu0 }
 0x1d8   : > { %v969_v42 = vpack.c.bf16 %v963_v41, %v963_v41  ;;  %v2186_v43 = vpop.f32.mrb[9].mxu0 }
 0x1d9   : > { %v966_v44 = vpop.f32.mrb[10].mxu0 }
 0x1da   : > { %v1026_v45 = vsel %vm676_vm1, %v969_v42, 0  ;;  %v2187_v46 = vpop.f32.mrb[11].mxu0 }
 0x1db   : > { %2195 = vmatpush3.bf16.xpose.msra.mxu0 %v1026_v45  ;;  %v1485_v46 = vld [vmem:[#allocation2 + $0xc] sm:$0xf] }
 0x1dc   : > { %2206 = vmatprep.subr.bf16.mxu0 %v2472_v1 }
 0x1e2   : > { %2197 = vmatmul.mubr.msk.bf16.vlgmr.msra.gmra.mrb[12].mxu0 %vm676_vm1, %v1021_v47 }
 0x1e3   : > { %2207 = vmatpush3.bf16.msra.mxu0 %v2359_v48  ;;  %2208 = vmatprep.mubr.msk.bf16.mxu0 %vm2473_vm0, %v2472_v1 }
 0x1e4   : > { %2218 = vmatprep.subr.bf16.mxu0 %v2472_v1 }
 0x1ea   : > { %2209 = vmatmul.mubr.msk.bf16.vlgmr.msra.gmra.mrb[16].mxu0 %vm692_vm2, %v2614_v4 }
 0x1eb   : > { %2220 = vmatprep.mubr.msk.bf16.mxu0 %vm2473_vm0, %v2472_v1 }
 0x260   : > { %v840_v56 = vpop.xlane.xlu0 %839 }
 0x261   : > { %v2738_v57 = vmax.f32 %v2735_v55, %v840_v56 }
 0x263   : > { %v842_v58 = vsub.f32 %v2735_v55, %v2738_v57  ;;  %918 = vst.msk [vmem:[#allocation3] sm:$0xff] %vm667_vm5, %v2738_v57  ;;  %847 = vperm.xlu0 %2350, %v2738_v57  }
 0x2b5   : > { %v1062_v9 = vpop.f32.mrb[12].mxu0 }
 0x2b6   : > { %v2749_v10 = vadd.f32 %v1062_v9, %v2714_v34  ;;  %v2198_v11 = vpop.f32.mrb[13].mxu0 }
 0x2b7   : > { %v1065_v12 = vpop.f32.mrb[14].mxu0 }
 0x2b8   : > { %v2199_v13 = vpop.f32.mrb[15].mxu0  ;;  %v1070_v14 = vsel %vm676_vm1, %v2749_v10, -inf }
 0x2b9   : > { %1071 = vmax.xlane.f32.xlu1 %v1070_v14 }
 0x2bd   : > { %v1195_v15 = vpop.f32.mrb[16].mxu0 }
 0x2be   : > { %v1201_v16 = vpack.c.bf16 %v1195_v15, %v1195_v15  ;;  %v2210_v17 = vpop.f32.mrb[17].mxu0 }
 0x2bf   : > { %v1198_v18 = vpop.f32.mrb[18].mxu0 }
 0x2c0   : > { %v1258_v19 = vsel %vm676_vm1, %v1201_v16, 0  ;;  %v2211_v20 = vpop.f32.mrb[19].mxu0 }
 0x2c1   : > { %2219 = vmatpush3.bf16.xpose.msra.mxu0 %v1258_v19 }
 0x2c2   : > { %2230 = vmatprep.subr.bf16.mxu0 %v2472_v1 }
 0x2c8   : > { %2221 = vmatmul.mubr.msk.bf16.vlgmr.msra.gmra.mrb[20].mxu0 %vm676_vm1, %v1253_v21 }
 0x2c9   : > { %2231 = vmatpush3.bf16.msra.mxu0 %v2364_v22  ;;  %2232 = vmatprep.mubr.msk.bf16.mxu0 %vm2473_vm0, %v2472_v1 }
 0x2ca   : > { %2242 = vmatprep.subr.bf16.mxu0 %v2472_v1 }
 0x2d0   : > { %2233 = vmatmul.mubr.msk.bf16.vlgmr.msra.gmra.mrb[24].mxu0 %vm692_vm2, %v2614_v4  ;;  %v2782_v4 = vld [vmem:[#allocation3 + $0x8] sm:$0xff] }
 0x2d1   : > { %2244 = vmatprep.mubr.msk.bf16.mxu0 %vm2473_vm0, %v2472_v1 }
 0x2e2   : > { %v848_v23 = vpop.permute.xlu0 %847 }
 0x2e3   : > { %v850_v24 = vsub.f32 %v2717_v36, %v848_v23 }
 0x2e5   : > { %v851_v25 = vmul.f32 1.442695, %v850_v24 }
 0x2e7   : > { %2368 = vpow2.f32 %v851_v25 }
 0x2f1   : > { %v2767_v26 = vpop.eup %2368 }
 0x2f2   : > { %v868_v28 = vpack.c.bf16 %v2767_v26, %v2767_v26 }
 0x2f4   : > { %2179 = vmatmul.mubr.msk.bf16.vlgmr.msra.gmra.mrb[20].mxu1 %vm676_vm1, %v868_v28 }
 0x2f5   : > { %2189 = vmatpush3.bf16.msra.mxu1 %v2365_v27  ;;  %2190 = vmatprep.mubr.msk.bf16.mxu1 %vm2473_vm0, %v2472_v1 }
 0x2f6   : > { %2200 = vmatprep.subr.bf16.mxu1 %v2472_v1 }
 0x2fc   : > { %2191 = vmatmul.mubr.msk.bf16.vlgmr.msra.gmra.mrb[24].mxu1 %vm692_vm2, %v2705_v33 }
 0x2fd   : > { %2202 = vmatprep.mubr.msk.bf16.mxu1 %vm2473_vm0, %v2472_v1 }
 0x346   : > { %v1072_v29 = vpop.xlane.xlu1 %1071 }
 0x347   : > { %v2785_v30 = vmax.f32 %v2782_v4, %v1072_v29 }
 0x349   : > { %v1074_v31 = vsub.f32 %v2782_v4, %v2785_v30  ;;  %1150 = vst.msk [vmem:[#allocation3 + $0x8] sm:$0xff] %vm667_vm5, %v2785_v30  ;;  %1079 = vperm.xlu1 %2351, %v2785_v30  }
 0x39b   : > { %v1294_v32 = vpop.f32.mrb[20].mxu0 }
 0x39c   : > { %v2793_v35 = vadd.f32 %v1294_v32, %v2714_v34  ;;  %v2222_v36 = vpop.f32.mrb[21].mxu0  ;;  %v2367_v32 = vld [vmem:[%s2957_s6 + $0x18] sm:$0xff]  }
 0x39d   : > { %v1297_v37 = vpop.f32.mrb[22].mxu0 }
 0x39e   : > { %v2223_v38 = vpop.f32.mrb[23].mxu0  ;;  %v1302_v39 = vsel %vm676_vm1, %v2793_v35, -inf  ;;  %v1075_v37 = vmul.f32 1.442695, %v1074_v31 }
 0x39f   : > { %1303 = vmax.xlane.f32.xlu1 %v1302_v39  ;;  %v1533_v38 = vld [vmem:[#allocation3 + $0x18] sm:$0xff] }
 0x3a3   : > { %v1427_v40 = vpop.f32.mrb[24].mxu0 }
 0x3a4   : > { %v1433_v41 = vpack.c.bf16 %v1427_v40, %v1427_v40  ;;  %v2234_v42 = vpop.f32.mrb[25].mxu0 }
 0x3a5   : > { %v1430_v43 = vpop.f32.mrb[26].mxu0 }
 0x3a6   : > { %v1490_v44 = vsel %vm676_vm1, %v1433_v41, 0  ;;  %v2235_v45 = vpop.f32.mrb[27].mxu0  ;;  %v1086_v41 = vld [vmem:[#allocation4 + $0x8] sm:$0xff] }
 0x3a7   : > { %2243 = vmatpush3.bf16.xpose.msra.mxu0 %v1490_v44 }
 0x3a8   : > { %2254 = vmatprep.subr.bf16.mxu0 %v2472_v1 }
 0x3ae   : > { %2245 = vmatmul.mubr.msk.bf16.vlgmr.msra.gmra.mrb[28].mxu0 %vm676_vm1, %v1485_v46 }
 0x3af   : > { %2256 = vmatprep.mubr.msk.bf16.mxu0 %vm2473_vm0, %v2472_v1 }
 0x3c7   : > { %v2802_v47 = vpop.f32.mrb[20].mxu1 }
 0x3c8   : > { %v1080_v48 = vpop.permute.xlu1 %1079  ;;  %v2180_v49 = vpop.f32.mrb[21].mxu1 }
 0x3c9   : > { %v1082_v50 = vsub.f32 %v2749_v10, %v1080_v48  ;;  %v913_v51 = vpop.f32.mrb[22].mxu1  ;;  %v1318_v48 = vld [vmem:[#allocation4 + $0x10] sm:$0xff] }
 0x3ca   : > { %v2181_v52 = vpop.f32.mrb[23].mxu1 }
 0x3cb   : > { %v1083_v53 = vmul.f32 1.442695, %v1082_v50 }
 0x3cd   : > { %2370 = vpow2.f32 %v1083_v53 }
 0x3cf   : > { %v1013_v54 = vpop.f32.mrb[24].mxu1 }
 0x3d0   : > { %v1019_v56 = vpack.c.bf16 %v1013_v54, %v1013_v54  ;;  %v2192_v59 = vpop.f32.mrb[25].mxu1 }
 0x3d1   : > { %v1016_v60 = vpop.f32.mrb[26].mxu1 }
 0x3d2   : > { %v1106_v61 = vsel %vm872_vm6, %v1019_v56, 0  ;;  %v2193_v62 = vpop.f32.mrb[27].mxu1 }
 0x3d3   : > { %2201 = vmatpush3.bf16.msra.mxu1 %v1106_v61 }
 0x3d4   : > { %2212 = vmatprep.subr.bf16.mxu1 %v2472_v1 }
 0x3d7   : > { %v2371_v63 = vpop.eup %2370 }
 0x3d8   : > { %v1101_v2 = vpack.c.bf16 %v2371_v63, %v2371_v63  ;;  %v1088_v15 = vsel %vm676_vm1, %v2371_v63, 0.0 }
 0x3da   : > { %2203 = vmatmul.mubr.msk.bf16.vlgmr.msra.gmra.mrb[28].mxu1 %vm676_vm1, %v1101_v2 }
 0x3db   : > { %2213 = vmatpush3.bf16.msra.mxu1 %v2366_v0  ;;  %2214 = vmatprep.mubr.msk.bf16.mxu1 %vm2473_vm0, %v2472_v1 }
 0x3dc   : > { %2224 = vmatprep.subr.bf16.mxu1 %v2472_v1 }
 0x3e2   : > { %2215 = vmatmul.mubr.msk.bf16.vlgmr.msra.gmra.mrb[32].mxu1 %vm692_vm2, %v2705_v33 }
 0x3e3   : > { %2226 = vmatprep.mubr.msk.bf16.mxu1 %vm2473_vm0, %v2472_v1 }
 0x42c   : > { %v1304_v6 = vpop.xlane.xlu1 %1303 }
 0x42d   : > { %v1305_v7 = vmax.f32 %v1301_v3, %v1304_v6 }
 0x42f   : > { %v1306_v8 = vsub.f32 %v1301_v3, %v1305_v7  ;;  %1382 = vst.msk [vmem:[#allocation3 + $0x10] sm:$0xff] %vm667_vm5, %v1305_v7  ;;  %1311 = vperm.xlu0 %2350, %v1305_v7  }
 0x431   : > { %v1307_v4 = vmul.f32 1.442695, %v1306_v8 }
 0x481   : > { %v1526_v9 = vpop.f32.mrb[28].mxu0 }
 0x482   : > { %v2820_v10 = vadd.f32 %v1526_v9, %v2714_v34  ;;  %v2246_v11 = vpop.f32.mrb[29].mxu0 }
 0x483   : > { %v1529_v12 = vpop.f32.mrb[30].mxu0 }
 0x484   : > { %v2247_v13 = vpop.f32.mrb[31].mxu0  ;;  %v1534_v14 = vsel %vm676_vm1, %v2820_v10, -inf  ;;  %v853_v12 = vld [vmem:[#allocation4] sm:$0xff] }
 0x485   : > { %1535 = vmax.xlane.f32.xlu0 %v1534_v14 }
 0x489   : > { %1089 = vadd.xlane.f32.xlu0 %v1088_v15 }
 0x4ad   : > { %v2825_v16 = vpop.f32.mrb[28].mxu1 }
 0x4ae   : > { %v1312_v17 = vpop.permute.xlu0 %1311  ;;  %v2204_v18 = vpop.f32.mrb[29].mxu1 }
 0x4af   : > { %v1314_v19 = vsub.f32 %v2793_v35, %v1312_v17  ;;  %v1145_v20 = vpop.f32.mrb[30].mxu1  ;;  %v1094_v17 = vld [vmem:[#allocation5 + $0x8] sm:$0xff] }
 0x4b0   : > { %v2205_v21 = vpop.f32.mrb[31].mxu1 }
 0x4b1   : > { %v1315_v34 = vmul.f32 1.442695, %v1314_v19 }
 0x4b3   : > { %2372 = vpow2.f32 %v1315_v34  ;;  %v1629_v34 = vld [vmem:[%s2958_s7] sm:$0xf] }
 0x4b4   : > { %2374 = vpow2.f32 %v1075_v37 }
 0x4b5   : > { %v1245_v22 = vpop.f32.mrb[32].mxu1  ;;  %2376 = vpow2.f32 %v1307_v4 }
 0x4b6   : > { %v1251_v23 = vpack.c.bf16 %v1245_v22, %v1245_v22  ;;  %v2216_v24 = vpop.f32.mrb[33].mxu1  ;;  %v1634_v22 = vsel %vm872_vm6, %v1629_v34, 0 }
 0x4b7   : > { %v1248_v25 = vpop.f32.mrb[34].mxu1  ;;  %2255 = vmatpush3.bf16.msra.mxu0 %v1634_v22  ;;  %v1550_v24 = vld [vmem:[#allocation4 + $0x18] sm:$0xff] }
 0x4b8   : > { %v1338_v27 = vsel %vm872_vm6, %v1251_v23, 0  ;;  %v2217_v28 = vpop.f32.mrb[35].mxu1  ;;  %2260 = vmatprep.subr.bf16.mxu0 %v2472_v1 }
 0x4b9   : > { %2225 = vmatpush3.bf16.msra.mxu1 %v1338_v27 }
 0x4ba   : > { %2236 = vmatprep.subr.bf16.mxu1 %v2472_v1 }
 0x4bd   : > { %v2373_v29 = vpop.eup %2372 }
 0x4be   : > { %v1320_v35 = vsel %vm676_vm1, %v2373_v29, 0.0  ;;  %v1333_v36 = vpack.c.bf16 %v2373_v29, %v2373_v29  ;;  %v2375_v39 = vpop.eup %2374  ;;  %v861_v29 = vld [vmem:[#allocation5] sm:$0xff] }
 0x4bf   : > { %1321 = vadd.xlane.f32.xlu0 %v1320_v35  ;;  %v1087_v43 = vmul.f32 %v2375_v39, %v1086_v41  ;;  %v2377_v46 = vpop.eup %2376  ;;  %v2064_v41 = vld [vmem:[%s2958_s7 + $0x4] sm:$0xf] }
 0x4c0   : > { %2227 = vmatmul.mubr.msk.bf16.vlgmr.msra.gmra.mrb[36].mxu1 %vm676_vm1, %v1333_v36  ;;  %v1319_v49 = vmul.f32 %v2377_v46, %v1318_v48  ;;  %v2066_v48 = vld [vmem:[%s2958_s7 + $0x8] sm:$0xf] }
 0x4c1   : > { %2237 = vmatpush3.bf16.msra.mxu1 %v2367_v32  ;;  %2238 = vmatprep.mubr.msk.bf16.mxu1 %vm2473_vm0, %v2472_v1 }
 0x4c2   : > { %2248 = vmatprep.subr.bf16.mxu1 %v2472_v1 }
 0x4c8   : > { %2239 = vmatmul.mubr.msk.bf16.vlgmr.msra.gmra.mrb[40].mxu1 %vm692_vm2, %v2705_v33  ;;  %v855_v33 = vsel %vm676_vm1, %v2767_v26, 0.0 }
 0x4c9   : > { %2250 = vmatprep.mubr.msk.bf16.mxu1 %vm2473_vm0, %v2472_v1 }
 0x512   : > { %v1536_v40 = vpop.xlane.xlu0 %1535 }
 0x513   : > { %v1537_v42 = vmax.f32 %v1533_v38, %v1536_v40 }
 0x515   : > { %1614 = vst.msk [vmem:[#allocation3 + $0x18] sm:$0xff] %vm667_vm5, %v1537_v42  ;;  %1543 = vperm.xlu1 %2351, %v1537_v42   ;;  %v1538_v30 = vsub.f32 %v1533_v38, %v1537_v42 }
 0x516   : > { %v1090_v44 = vpop.xlane.xlu0 %1089 }
 0x517   : > { %v1091_v45 = vadd.f32 %v1090_v44, %v1087_v43  ;;  %v1539_v31 = vmul.f32 1.442695, %v1538_v30  ;;  %v1326_v43 = vld [vmem:[#allocation5 + $0x10] sm:$0xff] }
 0x519   : > { %1092 = vst.msk [vmem:[#allocation4 + $0x8] sm:$0xff] %vm667_vm5, %v1091_v45  ;;  %2378 = vpow2.f32 %v1539_v31  ;;  %v1693_v45 = vsel %vm872_vm6, %v2064_v41, 0 }
 0x520   : > { %v1677_v55 = vld [vmem:[#allocation4 + $0x8] sm:$0xff] }
 0x523   : > { %v2379_v51 = vpop.eup %2378 }
 0x524   : > { %v1551_v25 = vmul.f32 %v2379_v51, %v1550_v24 }
 0x539   : > { %856 = vadd.xlane.f32.xlu1 %v855_v33 }
 0x54a   : > { %1097 = vperm.xlu1 %2351, %v2375_v39  }
 0x54c   : > { %v1322_v50 = vpop.xlane.xlu0 %1321 }
 0x54d   : > { %v1323_v52 = vadd.f32 %v1322_v50, %v1319_v49  ;;  %v1752_v50 = vsel %vm872_vm6, %v2066_v48, 0 }
 0x54e   : > { %1561 = vperm.xlu1 %2351, %v2379_v51  }
 0x54f   : > { %1324 = vst.msk [vmem:[#allocation4 + $0x10] sm:$0xff] %vm667_vm5, %v1323_v52 }
 0x556   : > { %v1736_v57 = vld [vmem:[#allocation4 + $0x10] sm:$0xff] }
 0x593   : > { %v2850_v53 = vpop.f32.mrb[36].mxu1 }
 0x594   : > { %v1544_v54 = vpop.permute.xlu1 %1543  ;;  %v2228_v26 = vpop.f32.mrb[37].mxu1 }
 0x595   : > { %v1546_v56 = vsub.f32 %v2820_v10, %v1544_v54  ;;  %v1377_v59 = vpop.f32.mrb[38].mxu1  ;;  %v843_v10 = vmul.f32 1.442695, %v842_v58  ;;  %v2068_v54 = vld [vmem:[%s2958_s7 + $0xc] sm:$0xf] }
 0x596   : > { %v2229_v60 = vpop.f32.mrb[39].mxu1  ;;  %v1558_v26 = vld [vmem:[#allocation5 + $0x18] sm:$0xff] }
 0x597   : > { %v1547_v61 = vmul.f32 1.442695, %v1546_v56  ;;  %v1811_v60 = vsel %vm872_vm6, %v2068_v54, 0 }
 0x599   : > { %2380 = vpow2.f32 %v1547_v61 }
 0x59a   : > { %2382 = vpow2.f32 %v843_v10 }
 0x59b   : > { %v1477_v62 = vpop.f32.mrb[40].mxu1 }
 0x59c   : > { %v1483_v63 = vpack.c.bf16 %v1477_v62, %v1477_v62  ;;  %v2240_v0 = vpop.f32.mrb[41].mxu1 }
 0x59d   : > { %v1480_v2 = vpop.f32.mrb[42].mxu1 }
 0x59e   : > { %v1570_v3 = vsel %vm872_vm6, %v1483_v63, 0  ;;  %v2241_v6 = vpop.f32.mrb[43].mxu1 }
 0x59f   : > { %2249 = vmatpush3.bf16.msra.mxu1 %v1570_v3 }
 0x5a3   : > { %v2381_v7 = vpop.eup %2380 }
 0x5a4   : > { %v1552_v8 = vsel %vm676_vm1, %v2381_v7, 0.0  ;;  %v1565_v9 = vpack.c.bf16 %v2381_v7, %v2381_v7  ;;  %v2383_v11 = vpop.eup %2382 }
 0x5a5   : > { %1553 = vadd.xlane.f32.xlu0 %v1552_v8  ;;  %v854_v13 = vmul.f32 %v2383_v11, %v853_v12 }
 0x5a6   : > { %2251 = vmatmul.mubr.msk.bf16.vlgmr.msra.gmra.mrb[44].mxu1 %vm676_vm1, %v1565_v9 }
 0x5bb   : > { %864 = vperm.xlu0 %2350, %v2383_v11  }
 0x5c6   : > { %v857_v14 = vpop.xlane.xlu1 %856 }
 0x5c7   : > { %v858_v15 = vadd.f32 %v857_v14, %v854_v13 }
 0x5c9   : > { %860 = vst.msk [vmem:[#allocation4] sm:$0xff] %vm667_vm5, %v858_v15 }
 0x5ca   : > { %v1098_v18 = vpop.permute.xlu1 %1097 }
 0x5cb   : > { %v1100_v19 = vmul.f32 %v1098_v18, %v1094_v17 }
 0x5cd   : > { %v1148_v20 = vadd.f32 %v2825_v16, %v1100_v19 }
 0x5ce   : > { %v1562_v56 = vpop.permute.xlu1 %1561 }
 0x5cf   : > { %1149 = vst.msk [vmem:[#allocation5 + $0x8] sm:$0xff] %vm676_vm1, %v1148_v20  ;;  %v1564_v61 = vmul.f32 %v1562_v56, %v1558_v26 }
 0x5d0   : > { %v1619_v21 = vld [vmem:[#allocation4] sm:$0xff] }
 0x5d1   : > { %2384 = vrcp.f32 %v1619_v21 }
 0x5d2   : > { %2386 = vrcp.f32 %v1677_v55 }
 0x5d3   : > { %2388 = vrcp.f32 %v1736_v57 }
 0x5d6   : > { %v1679_v31 = vld [vmem:[#allocation5 + $0x8] sm:$0xff] }
 0x5db   : > { %v2385_v58 = vpop.eup %2384 }
 0x5dc   : > { %1624 = vperm.xlu0 %2350, %v2385_v58   ;;  %v2387_v16 = vpop.eup %2386 }
 0x5dd   : > { %v2389_v23 = vpop.eup %2388 }
 0x5e0   : > { %1329 = vperm.xlu0 %2350, %v2377_v46  }
 0x5e4   : > { %1682 = vperm.xlu0 %2350, %v2387_v16  }
 0x5e8   : > { %1741 = vperm.xlu0 %2350, %v2389_v23  }
 0x632   : > { %v1554_v27 = vpop.xlane.xlu0 %1553 }
 0x633   : > { %v1555_v28 = vadd.f32 %v1554_v27, %v1551_v25 }
 0x635   : > { %1556 = vst.msk [vmem:[#allocation4 + $0x18] sm:$0xff] %vm667_vm5, %v1555_v28 }
 0x63a   : > { %v865_v32 = vpop.permute.xlu0 %864 }
 0x63b   : > { %v867_v35 = vmul.f32 %v865_v32, %v861_v29 }
 0x63c   : > { %v1795_v36 = vld [vmem:[#allocation4 + $0x18] sm:$0xff] }
 0x63d   : > { %v916_v37 = vadd.f32 %v2802_v47, %v867_v35  ;;  %2390 = vrcp.f32 %v1795_v36 }
 0x63f   : > { %917 = vst.msk [vmem:[#allocation5] sm:$0xff] %vm676_vm1, %v916_v37 }
 0x646   : > { %v1621_v40 = vld [vmem:[#allocation5] sm:$0xff] }
 0x647   : > { %v2391_v38 = vpop.eup %2390 }
 0x648   : > { %1800 = vperm.xlu1 %2351, %v2391_v38  }
 0x65b   : > { %v1625_v39 = vpop.permute.xlu0 %1624 }
 0x65c   : > { %v1627_v42 = vmul.f32 %v1625_v39, %v1621_v40 }
 0x65e   : > { %v1628_v44 = vpack.c.bf16 %v1627_v42, %v1627_v42 }
 0x65f   : > { %v1330_v33 = vpop.permute.xlu0 %1329 }
 0x660   : > { %v1332_v4 = vmul.f32 %v1330_v33, %v1326_v43  ;;  %2257 = vmatmul.mubr.msk.bf16.vlgmr.msra.gmra.mrb[32].mxu0 %vm676_vm1, %v1628_v44 }
 0x661   : > { %2261 = vmatpush3.bf16.msra.mxu0 %v1693_v45  ;;  %2262 = vmatprep.mubr.msk.bf16.mxu0 %vm2473_vm0, %v2472_v1 }
 0x662   : > { %v1380_v47 = vadd.f32 %v2850_v53, %v1332_v4  ;;  %2266 = vmatprep.subr.bf16.mxu0 %v2472_v1 }
 0x663   : > { %v1683_v30 = vpop.permute.xlu0 %1682 }
 0x664   : > { %1381 = vst.msk [vmem:[#allocation5 + $0x10] sm:$0xff] %vm676_vm1, %v1380_v47  ;;  %v1685_v46 = vmul.f32 %v1683_v30, %v1679_v31 }
 0x666   : > { %v1686_v49 = vpack.c.bf16 %v1685_v46, %v1685_v46 }
 0x667   : > { %v1742_v52 = vpop.permute.xlu0 %1741 }
 0x66b   : > { %v1738_v51 = vld [vmem:[#allocation5 + $0x10] sm:$0xff] }
 0x66c   : > { %2263 = vmatmul.mubr.msk.bf16.vlgmr.msra.gmra.mrb[32].mxu0 %vm676_vm1, %v1686_v49  ;;  %v1744_v53 = vmul.f32 %v1742_v52, %v1738_v51 }
 0x66d   : > { %2267 = vmatpush3.bf16.msra.mxu0 %v1752_v50  ;;  %2268 = vmatprep.mubr.msk.bf16.mxu0 %vm2473_vm0, %v2472_v1 }
 0x66e   : > { %2272 = vmatprep.subr.bf16.mxu0 %v2472_v1  ;;  %v1745_v59 = vpack.c.bf16 %v1744_v53, %v1744_v53 }
 0x678   : > { %2269 = vmatmul.mubr.msk.bf16.vlgmr.msra.gmra.mrb[32].mxu0 %vm676_vm1, %v1745_v59 }
 0x679   : > { %v1606_v62 = vpop.f32.mrb[44].mxu1  ;;  %2273 = vmatpush3.bf16.msra.mxu0 %v1811_v60  ;;  %2274 = vmatprep.mubr.msk.bf16.mxu0 %vm2473_vm0, %v2472_v1 }
 0x67a   : > { %v1612_v63 = vadd.f32 %v1606_v62, %v1564_v61  ;;  %v2252_v0 = vpop.f32.mrb[45].mxu1 }
 0x67b   : > { %v1609_v2 = vpop.f32.mrb[46].mxu1 }
 0x67c   : > { %1613 = vst.msk [vmem:[#allocation5 + $0x18] sm:$0xff] %vm676_vm1, %v1612_v63  ;;  %v2253_v3 = vpop.f32.mrb[47].mxu1 }
 0x683   : > { %v1797_v7 = vld [vmem:[#allocation5 + $0x18] sm:$0xff] }
 0x6c7   : > { %v1801_v6 = vpop.permute.xlu1 %1800 }
 0x6c8   : > { %v1803_v8 = vmul.f32 %v1801_v6, %v1797_v7 }
 0x6ca   : > { %v1804_v9 = vpack.c.bf16 %v1803_v8, %v1803_v8 }
 0x6cc   : > { %2275 = vmatmul.mubr.msk.bf16.vlgmr.msra.gmra.mrb[32].mxu0 %vm676_vm1, %v1804_v9 }
 0x79f   : > { %v1847_v10 = vpop.f32.mrb[32].mxu0 }
 0x7a0   : > { %v2278_v1 = vadd.f32 %v1847_v10, %v2621_v5  ;;  %v2276_v11 = vpop.f32.mrb[33].mxu0 }
 0x7a1   : > { %v1850_v12 = vpop.f32.mrb[34].mxu0 }
 0x7a2   : > { %v2277_v13 = vpop.f32.mrb[35].mxu0  ;;  %1855 = vst.msk [vmem:[%s388_s20] sm:$0xff] %vm440_vm3, %v2278_v1 }
 0x7a3   : > { %2405 = shalt.err (!%p2402_p5)
}
 0x7a4   : > { %s2406_s14 = scalar_lea.hbm %s2903_s11, 128  ;;  %s2410_s20 = scalar_lea.hbm %s2959_s8, 256 }
 0x7a5   : > { %p2407_p6 = scmp.ne.s32.totalorder %s2903_s11, %s2406_s14  ;;  %p2411_p10 = scmp.lt.u32.totalorder %s2903_s11, %s2959_s8 }
 0x7a6   : > { %p2412_p11 = scmp.lt.u32.totalorder %s2410_s20, %s2406_s14  ;;  %p2414_p13 = scmp.lt.u32.totalorder %s2406_s14, %s2903_s11 }
 0x7a7   : > { %p2408_p7 = pnand %p2407_p6, %p2562_p4 }
 0x7a8   : > { %p2413_p12 = por %p2412_p11, %p2411_p10 }
 0x7a9   : > { %p2409_p9 = pneg %p2408_p7 }
 0x7aa   : > { %p2415_p0 = por %p2414_p13, %p2413_p12 }
 0x7ac   : > { %p2416_p1 = pnand %p2415_p0, %p2409_p9 }
 0x7ae   : > { %2419 = shalt.err (!%p2416_p1)
}
 0x7af   : > { %2291 = dma.vmem_to_hbm [thread:$0]  (%p2562_p4), %s2905_s21, 128, %s2903_s11, %s1857_s30  }
 0x7b0 PF: > { %p2297_p2 = scmp.ge.s32.totalorder %s2470_s10, 2  ;;  %s1883_s23 = sand.u32 1, %s2450_s27  }
 0x7b1   : > { %s1884_s24 = scalar_lea.sflag [#allocation7], %s1883_s23 }
 0x7b2   : > { %p2294_p3 = pnand %p2297_p2, %p2569_p8 }
 0x7b4   : > { %2445 = dma.done.wait (!%p2294_p3), %s1884_s24, 128  }
 0x7b5   : > { %2447 = vsyncadd (!%p2294_p3), %s1884_s24, 4294967168  ;;  %s21_s10 = sadd.s32 1, %s2470_s10   ;;  %s2962_s27 = smov %s2454_s28 }
 0x7b6   : > { %p18_p5 = scmp.ge.s32.totalorder %s21_s10, 4   ;;  %s2963_s28 = smov %s2458_s29 }
 0x7b7   : > { %s2964_s29 = smov %s2575_s18  ;;  %s2965_s30 = smov %s2466_s9 }
 0x7b8   : > { %s2966_s9 = smov %s2968_s13  ;;  %20 = sbr.rel (!%p18_p5) target bundleno = 4 (0x4), region = 131 }
 0x7bf   :  { %1889 = vsyncpa [#allocation7], 1 }
 0x7c0   :  { %1891 = vsyncpa [#allocation7 + $0x1], 1 }

</bundles_post_ra>
